<compile_context>
chip_gen: v7x
topology: tpu7x:2x2x1
jax: 0.10.0
libtpu: 0.0.40
codegen_flags: <defaults>
</compile_context>

<pallas_src>
import functools

import numpy as np
import jax
import jax.numpy as jnp
from jax.experimental import pallas as pl
from jax.experimental.pallas import tpu as pltpu

EPS = 1e-3                                    # Charbonnier eps
_K1D = (0.05, 0.25, 0.4, 0.25, 0.05)          # 1-D Gaussian taps (H and W)
_K0, _K1, _K2 = 0.05, 0.25, 0.4               # symmetric-tap coefficients
# Depth taps are all ones (kernel = k.t()@k repeated over the 5 depth slices).


def _pick_batch_tile(b, cap=8):
    """Largest divisor of b that is <= cap (batches folded per grid step)."""
    for bt in range(min(b, cap), 0, -1):
        if b % bt == 0:
            return bt
    return 1


def _edge_loss_kernel(x_ref, y_ref, w_ref, out_ref, *, Bt, D, H, W):
    t = pl.program_id(0)
    HW = H * W

    # ---- hoisted once per grid step: positions, boundary masks, down-mask ----
    d_pos = jax.lax.broadcasted_iota(jnp.int32, (D, HW), 0)
    m_idx = jax.lax.broadcasted_iota(jnp.int32, (D, HW), 1)
    if (W & (W - 1)) == 0:                     # power-of-two fast path
        w_pos = m_idx & (W - 1)
        h_pos = m_idx >> (W.bit_length() - 1)
    else:
        w_pos = m_idx % W
        h_pos = m_idx // W

    w_masks = (w_pos >= 1, w_pos >= 2, w_pos <= W - 2, w_pos <= W - 3)
    h_masks = (h_pos >= 1, h_pos >= 2, h_pos <= H - 2, h_pos <= H - 3)
    d_masks = (d_pos >= 1, d_pos >= 2, d_pos <= D - 2, d_pos <= D - 3)

    # new_filter[::2, ::2, ::2] = down * 4  ->  single vmul by a {0, 4} field.
    down_mult = jnp.where(
        ((d_pos & 1) == 0) & ((h_pos & 1) == 0) & ((w_pos & 1) == 0),
        jnp.float32(4.0), jnp.float32(0.0))

    def shifted(v, masks, axis, stride):
        """Clamped (replicate-boundary) +/-1 and +/-2 neighbours along an axis.

        `v` is (D, HW); logical neighbours live `stride` positions apart along
        `axis`.  pltpu.roll wraps cyclically over the full axis, so the wrap is
        redirected to the clamped edge element via the precomputed masks.
        Shifts are canonicalised to non-negative rotations of the full axis.
        """
        ge1, ge2, le2, le3 = masks
        n = v.shape[axis]
        m1 = jnp.where(ge1, pltpu.roll(v, stride % n, axis=axis), v)
        m2 = jnp.where(ge2, pltpu.roll(v, (2 * stride) % n, axis=axis), m1)
        p1 = jnp.where(le2, pltpu.roll(v, (-stride) % n, axis=axis), v)
        p2 = jnp.where(le3, pltpu.roll(v, (-2 * stride) % n, axis=axis), p1)
        return m2, m1, p1, p2

    def gauss5(v, masks, axis, stride):
        # Symmetric Gaussian taps: 3 muls + 4 adds.
        m2, m1, p1, p2 = shifted(v, masks, axis, stride)
        return _K0 * (m2 + p2) + _K1 * (m1 + p1) + _K2 * v

    def box5(v, masks, axis, stride):
        # Depth taps are all ones: pure adds (no MXU, no extra operand).
        m2, m1, p1, p2 = shifted(v, masks, axis, stride)
        return (m2 + p2) + (m1 + p1) + v

    def conv_gauss(v):
        v = gauss5(v, w_masks, 1, 1)           # width  conv (lane stride 1)
        v = gauss5(v, h_masks, 1, W)           # height conv (lane stride W)
        return box5(v, d_masks, 0, 1)          # depth  conv (sublane stride 1)

    def laplacian(v):
        return v - conv_gauss(conv_gauss(v) * down_mult)

    def body(b, acc):
        wgt = 10.0 * w_ref[t * Bt + b]
        d = x_ref[b].astype(jnp.float32) - y_ref[b].astype(jnp.float32)
        # Linearity: laplacian(x) - laplacian(y) == laplacian(x - y).
        diff = laplacian(d) * wgt
        return acc + jnp.sqrt(diff * diff + (EPS * EPS))

    acc = jax.lax.fori_loop(0, Bt, body, jnp.zeros((D, HW), jnp.float32),
                            unroll=True)

    # Lane-dense partial per grid step (cheap sublane reduce only); the tiny
    # cross-tile / cross-lane sum and the 1/N scale run in the JAX wrapper.
    out_ref[...] = jnp.sum(acc, axis=0, keepdims=True)


def weighted_edge_loss(x, y, weights):
    B, C, D, H, W = x.shape
    assert C == 1, "Weighted_EdgeLoss expects single-channel volumes (kernel is 1x1x5x5x5)"
    HW = H * W

    Bt = _pick_batch_tile(B)                   # batches folded per grid step
    num_tiles = B // Bt

    # Keep native dtype (cast to f32 inside the kernel after the DMA lands).
    x2 = x.reshape(B, D, HW)
    y2 = y.reshape(B, D, HW)
    w1 = weights.reshape(B).astype(jnp.float32)

    kernel = functools.partial(_edge_loss_kernel, Bt=Bt, D=D, H=H, W=W)

    partials = pl.pallas_call(
        kernel,
        out_shape=jax.ShapeDtypeStruct((num_tiles, 1, HW), jnp.float32),
        grid=(num_tiles,),
        in_specs=[
            pl.BlockSpec((Bt, D, HW), lambda t: (t, 0, 0)),     # x batch tile
            pl.BlockSpec((Bt, D, HW), lambda t: (t, 0, 0)),     # y batch tile
            pl.BlockSpec(memory_space=pltpu.MemorySpace.SMEM),  # weights (B,)
        ],
        out_specs=pl.BlockSpec((pl.Squeezed(), 1, HW), lambda t: (t, 0, 0)),
        # Per-tile partial outputs, no shared scratch -> batch tiles are
        # independent and megacore-shardable on v7x.
        compiler_params=pltpu.CompilerParams(
            dimension_semantics=("parallel",)),
    )(x2, y2, w1)

    inv_n = 1.0 / float(B * C * D * H * W)
    return jnp.sum(partials) * inv_n


def _reference_loss_np(x, y, w):
    """Straight NumPy port of the PyTorch module for validation."""
    k = np.asarray(_K1D, dtype=np.float32)
    k2 = np.outer(k, k)

    def conv_gauss(img):
        p = np.pad(img, ((0, 0), (0, 0), (2, 2), (2, 2), (2, 2)), mode="edge")
        out = np.zeros_like(img)
        D_, H_, W_ = img.shape[2:]
        for dd in range(5):
            for hh in range(5):
                for ww in range(5):
                    out = out + k2[hh, ww] * p[:, :, dd:dd + D_, hh:hh + H_, ww:ww + W_]
        return out

    def lap(cur):
        f = conv_gauss(cur)
        nf = np.zeros_like(f)
        nf[:, :, ::2, ::2, ::2] = f[:, :, ::2, ::2, ::2] * 4
        return cur - conv_gauss(nf)

    diff = (lap(x) - lap(y)) * 10.0 * w.reshape(x.shape[0], 1, 1, 1, 1)
    return np.mean(np.sqrt(diff * diff + EPS * EPS))


if __name__ == "__main__":
    key = jax.random.PRNGKey(0)
    kx, ky, kw = jax.random.split(key, 3)

    B, C, D, H, W = 2, 1, 8, 16, 16
    x = jax.random.normal(kx, (B, C, D, H, W), dtype=jnp.float32)
    y = jax.random.normal(ky, (B, C, D, H, W), dtype=jnp.float32)
    weights = jax.random.uniform(kw, (B,), dtype=jnp.float32, minval=0.5, maxval=1.5)

    loss = weighted_edge_loss(x, y, weights)
    loss = jax.block_until_ready(loss)

    ref = _reference_loss_np(np.asarray(x), np.asarray(y), np.asarray(weights))
    np.testing.assert_allclose(float(loss), float(ref), rtol=2e-2, atol=1e-4)

    print("KERNEL_OK")
</pallas_src>

<mosaic_0001>
module attributes {stable_mosaic.version = 11 : i64} {
  func.func @_edge_loss_kernel(%arg0: i32, %arg1: memref<2x8x256xf32, #tpu.memory_space<vmem>>, %arg2: memref<2x8x256xf32, #tpu.memory_space<vmem>>, %arg3: memref<2xf32, #tpu.memory_space<smem>>, %arg4: memref<1x1x256xf32, #tpu.memory_space<vmem>>) attributes {dimension_semantics = [#tpu.dimension_semantics<parallel>], iteration_bounds = array<i64: 1>, scalar_prefetch = 0 : i64, scratch_operands = 0 : i64, tpu.core_type = #tpu.core_type<tc>, window_params = [{transform_indices = @transform_0, window_bounds = array<i64: 2, 8, 256>}, {transform_indices = @transform_1, window_bounds = array<i64: 2, 8, 256>}, {transform_indices = @transform_2, window_bounds = array<i64: 2>}, {transform_indices = @transform_3, window_bounds = array<i64: 1, 1, 256>}]} {
    %0 = tpu.iota {dimensions = array<i32: 0>} : vector<8x256xi32>
    %1 = tpu.iota {dimensions = array<i32: 1>} : vector<8x256xi32>
    %c15_i32 = arith.constant 15 : i32
    %2 = vector.broadcast %c15_i32 : i32 to vector<8x256xi32>
    %3 = arith.andi %1, %2 : vector<8x256xi32>
    %c4_i32 = arith.constant 4 : i32
    %4 = vector.broadcast %c4_i32 : i32 to vector<8x256xi32>
    %5 = arith.shrsi %1, %4 : vector<8x256xi32>
    %c1_i32 = arith.constant 1 : i32
    %6 = vector.broadcast %c1_i32 : i32 to vector<8x256xi32>
    %7 = arith.cmpi sge, %3, %6 : vector<8x256xi32>
    %c2_i32 = arith.constant 2 : i32
    %8 = vector.broadcast %c2_i32 : i32 to vector<8x256xi32>
    %9 = arith.cmpi sge, %3, %8 : vector<8x256xi32>
    %c14_i32 = arith.constant 14 : i32
    %10 = vector.broadcast %c14_i32 : i32 to vector<8x256xi32>
    %11 = arith.cmpi sle, %3, %10 : vector<8x256xi32>
    %c13_i32 = arith.constant 13 : i32
    %12 = vector.broadcast %c13_i32 : i32 to vector<8x256xi32>
    %13 = arith.cmpi sle, %3, %12 : vector<8x256xi32>
    %c1_i32_0 = arith.constant 1 : i32
    %14 = vector.broadcast %c1_i32_0 : i32 to vector<8x256xi32>
    %15 = arith.cmpi sge, %5, %14 : vector<8x256xi32>
    %c2_i32_1 = arith.constant 2 : i32
    %16 = vector.broadcast %c2_i32_1 : i32 to vector<8x256xi32>
    %17 = arith.cmpi sge, %5, %16 : vector<8x256xi32>
    %c14_i32_2 = arith.constant 14 : i32
    %18 = vector.broadcast %c14_i32_2 : i32 to vector<8x256xi32>
    %19 = arith.cmpi sle, %5, %18 : vector<8x256xi32>
    %c13_i32_3 = arith.constant 13 : i32
    %20 = vector.broadcast %c13_i32_3 : i32 to vector<8x256xi32>
    %21 = arith.cmpi sle, %5, %20 : vector<8x256xi32>
    %c1_i32_4 = arith.constant 1 : i32
    %22 = vector.broadcast %c1_i32_4 : i32 to vector<8x256xi32>
    %23 = arith.cmpi sge, %0, %22 : vector<8x256xi32>
    %c2_i32_5 = arith.constant 2 : i32
    %24 = vector.broadcast %c2_i32_5 : i32 to vector<8x256xi32>
    %25 = arith.cmpi sge, %0, %24 : vector<8x256xi32>
    %c6_i32 = arith.constant 6 : i32
    %26 = vector.broadcast %c6_i32 : i32 to vector<8x256xi32>
    %27 = arith.cmpi sle, %0, %26 : vector<8x256xi32>
    %c5_i32 = arith.constant 5 : i32
    %28 = vector.broadcast %c5_i32 : i32 to vector<8x256xi32>
    %29 = arith.cmpi sle, %0, %28 : vector<8x256xi32>
    %c1_i32_6 = arith.constant 1 : i32
    %30 = vector.broadcast %c1_i32_6 : i32 to vector<8x256xi32>
    %31 = arith.andi %0, %30 : vector<8x256xi32>
    %c0_i32 = arith.constant 0 : i32
    %32 = vector.broadcast %c0_i32 : i32 to vector<8x256xi32>
    %33 = arith.cmpi eq, %31, %32 : vector<8x256xi32>
    %c1_i32_7 = arith.constant 1 : i32
    %34 = vector.broadcast %c1_i32_7 : i32 to vector<8x256xi32>
    %35 = arith.andi %5, %34 : vector<8x256xi32>
    %c0_i32_8 = arith.constant 0 : i32
    %36 = vector.broadcast %c0_i32_8 : i32 to vector<8x256xi32>
    %37 = arith.cmpi eq, %35, %36 : vector<8x256xi32>
    %38 = arith.andi %33, %37 : vector<8x256xi1>
    %c1_i32_9 = arith.constant 1 : i32
    %39 = vector.broadcast %c1_i32_9 : i32 to vector<8x256xi32>
    %40 = arith.andi %3, %39 : vector<8x256xi32>
    %c0_i32_10 = arith.constant 0 : i32
    %41 = vector.broadcast %c0_i32_10 : i32 to vector<8x256xi32>
    %42 = arith.cmpi eq, %40, %41 : vector<8x256xi32>
    %43 = arith.andi %38, %42 : vector<8x256xi1>
    %cst = arith.constant 4.000000e+00 : f32
    %cst_11 = arith.constant 0.000000e+00 : f32
    %44 = vector.broadcast %cst : f32 to vector<8x256xf32>
    %45 = vector.broadcast %cst_11 : f32 to vector<8x256xf32>
    %46 = arith.select %43, %44, %45 : vector<8x256xi1>, vector<8x256xf32>
    %cst_12 = arith.constant 0.000000e+00 : f32
    %47 = vector.broadcast %cst_12 : f32 to vector<8x256xf32>
    %c0_i32_13 = arith.constant 0 : i32
    %c2_i32_14 = arith.constant 2 : i32
    %48 = arith.muli %arg0, %c2_i32_14 : i32
    %49 = arith.addi %48, %c0_i32_13 : i32
    %50 = arith.index_cast %49 : i32 to index
    %51 = memref.load %arg3[%50] : memref<2xf32, #tpu.memory_space<smem>>
    %cst_15 = arith.constant 1.000000e+01 : f32
    %52 = arith.mulf %cst_15, %51 : f32
    %53 = arith.index_cast %c0_i32_13 : i32 to index
    %c0 = arith.constant 0 : index
    %c0_16 = arith.constant 0 : index
    %54 = vector.load %arg1[%53, %c0, %c0_16] : memref<2x8x256xf32, #tpu.memory_space<vmem>>, vector<1x8x256xf32>
    %55 = vector.shape_cast %54 : vector<1x8x256xf32> to vector<8x256xf32>
    %56 = arith.index_cast %c0_i32_13 : i32 to index
    %c0_17 = arith.constant 0 : index
    %c0_18 = arith.constant 0 : index
    %57 = vector.load %arg2[%56, %c0_17, %c0_18] : memref<2x8x256xf32, #tpu.memory_space<vmem>>, vector<1x8x256xf32>
    %58 = vector.shape_cast %57 : vector<1x8x256xf32> to vector<8x256xf32>
    %59 = arith.subf %55, %58 : vector<8x256xf32>
    %c1_i32_19 = arith.constant 1 : i32
    %60 = tpu.dynamic_rotate %59 by %c1_i32_19 dim 1 : vector<8x256xf32>, i32 -> vector<8x256xf32>
    %61 = arith.select %7, %60, %59 : vector<8x256xi1>, vector<8x256xf32>
    %c2_i32_20 = arith.constant 2 : i32
    %62 = tpu.dynamic_rotate %59 by %c2_i32_20 dim 1 : vector<8x256xf32>, i32 -> vector<8x256xf32>
    %63 = arith.select %9, %62, %61 : vector<8x256xi1>, vector<8x256xf32>
    %c255_i32 = arith.constant 255 : i32
    %64 = tpu.dynamic_rotate %59 by %c255_i32 dim 1 : vector<8x256xf32>, i32 -> vector<8x256xf32>
    %65 = arith.select %11, %64, %59 : vector<8x256xi1>, vector<8x256xf32>
    %c254_i32 = arith.constant 254 : i32
    %66 = tpu.dynamic_rotate %59 by %c254_i32 dim 1 : vector<8x256xf32>, i32 -> vector<8x256xf32>
    %67 = arith.select %13, %66, %65 : vector<8x256xi1>, vector<8x256xf32>
    %68 = arith.addf %63, %67 : vector<8x256xf32>
    %cst_21 = arith.constant 5.000000e-02 : f32
    %69 = vector.broadcast %cst_21 : f32 to vector<8x256xf32>
    %70 = arith.mulf %69, %68 : vector<8x256xf32>
    %71 = arith.addf %61, %65 : vector<8x256xf32>
    %cst_22 = arith.constant 2.500000e-01 : f32
    %72 = vector.broadcast %cst_22 : f32 to vector<8x256xf32>
    %73 = arith.mulf %72, %71 : vector<8x256xf32>
    %74 = arith.addf %70, %73 : vector<8x256xf32>
    %cst_23 = arith.constant 4.000000e-01 : f32
    %75 = vector.broadcast %cst_23 : f32 to vector<8x256xf32>
    %76 = arith.mulf %75, %59 : vector<8x256xf32>
    %77 = arith.addf %74, %76 : vector<8x256xf32>
    %c16_i32 = arith.constant 16 : i32
    %78 = tpu.dynamic_rotate %77 by %c16_i32 dim 1 : vector<8x256xf32>, i32 -> vector<8x256xf32>
    %79 = arith.select %15, %78, %77 : vector<8x256xi1>, vector<8x256xf32>
    %c32_i32 = arith.constant 32 : i32
    %80 = tpu.dynamic_rotate %77 by %c32_i32 dim 1 : vector<8x256xf32>, i32 -> vector<8x256xf32>
    %81 = arith.select %17, %80, %79 : vector<8x256xi1>, vector<8x256xf32>
    %c240_i32 = arith.constant 240 : i32
    %82 = tpu.dynamic_rotate %77 by %c240_i32 dim 1 : vector<8x256xf32>, i32 -> vector<8x256xf32>
    %83 = arith.select %19, %82, %77 : vector<8x256xi1>, vector<8x256xf32>
    %c224_i32 = arith.constant 224 : i32
    %84 = tpu.dynamic_rotate %77 by %c224_i32 dim 1 : vector<8x256xf32>, i32 -> vector<8x256xf32>
    %85 = arith.select %21, %84, %83 : vector<8x256xi1>, vector<8x256xf32>
    %86 = arith.addf %81, %85 : vector<8x256xf32>
    %cst_24 = arith.constant 5.000000e-02 : f32
    %87 = vector.broadcast %cst_24 : f32 to vector<8x256xf32>
    %88 = arith.mulf %87, %86 : vector<8x256xf32>
    %89 = arith.addf %79, %83 : vector<8x256xf32>
    %cst_25 = arith.constant 2.500000e-01 : f32
    %90 = vector.broadcast %cst_25 : f32 to vector<8x256xf32>
    %91 = arith.mulf %90, %89 : vector<8x256xf32>
    %92 = arith.addf %88, %91 : vector<8x256xf32>
    %cst_26 = arith.constant 4.000000e-01 : f32
    %93 = vector.broadcast %cst_26 : f32 to vector<8x256xf32>
    %94 = arith.mulf %93, %77 : vector<8x256xf32>
    %95 = arith.addf %92, %94 : vector<8x256xf32>
    %c1_i32_27 = arith.constant 1 : i32
    %96 = tpu.dynamic_rotate %95 by %c1_i32_27 dim 0 : vector<8x256xf32>, i32 -> vector<8x256xf32>
    %97 = arith.select %23, %96, %95 : vector<8x256xi1>, vector<8x256xf32>
    %c2_i32_28 = arith.constant 2 : i32
    %98 = tpu.dynamic_rotate %95 by %c2_i32_28 dim 0 : vector<8x256xf32>, i32 -> vector<8x256xf32>
    %99 = arith.select %25, %98, %97 : vector<8x256xi1>, vector<8x256xf32>
    %c7_i32 = arith.constant 7 : i32
    %100 = tpu.dynamic_rotate %95 by %c7_i32 dim 0 : vector<8x256xf32>, i32 -> vector<8x256xf32>
    %101 = arith.select %27, %100, %95 : vector<8x256xi1>, vector<8x256xf32>
    %c6_i32_29 = arith.constant 6 : i32
    %102 = tpu.dynamic_rotate %95 by %c6_i32_29 dim 0 : vector<8x256xf32>, i32 -> vector<8x256xf32>
    %103 = arith.select %29, %102, %101 : vector<8x256xi1>, vector<8x256xf32>
    %104 = arith.addf %99, %103 : vector<8x256xf32>
    %105 = arith.addf %97, %101 : vector<8x256xf32>
    %106 = arith.addf %104, %105 : vector<8x256xf32>
    %107 = arith.addf %106, %95 : vector<8x256xf32>
    %108 = arith.mulf %107, %46 : vector<8x256xf32>
    %c1_i32_30 = arith.constant 1 : i32
    %109 = tpu.dynamic_rotate %108 by %c1_i32_30 dim 1 : vector<8x256xf32>, i32 -> vector<8x256xf32>
    %110 = arith.select %7, %109, %108 : vector<8x256xi1>, vector<8x256xf32>
    %c2_i32_31 = arith.constant 2 : i32
    %111 = tpu.dynamic_rotate %108 by %c2_i32_31 dim 1 : vector<8x256xf32>, i32 -> vector<8x256xf32>
    %112 = arith.select %9, %111, %110 : vector<8x256xi1>, vector<8x256xf32>
    %c255_i32_32 = arith.constant 255 : i32
    %113 = tpu.dynamic_rotate %108 by %c255_i32_32 dim 1 : vector<8x256xf32>, i32 -> vector<8x256xf32>
    %114 = arith.select %11, %113, %108 : vector<8x256xi1>, vector<8x256xf32>
    %c254_i32_33 = arith.constant 254 : i32
    %115 = tpu.dynamic_rotate %108 by %c254_i32_33 dim 1 : vector<8x256xf32>, i32 -> vector<8x256xf32>
    %116 = arith.select %13, %115, %114 : vector<8x256xi1>, vector<8x256xf32>
    %117 = arith.addf %112, %116 : vector<8x256xf32>
    %cst_34 = arith.constant 5.000000e-02 : f32
    %118 = vector.broadcast %cst_34 : f32 to vector<8x256xf32>
    %119 = arith.mulf %118, %117 : vector<8x256xf32>
    %120 = arith.addf %110, %114 : vector<8x256xf32>
    %cst_35 = arith.constant 2.500000e-01 : f32
    %121 = vector.broadcast %cst_35 : f32 to vector<8x256xf32>
    %122 = arith.mulf %121, %120 : vector<8x256xf32>
    %123 = arith.addf %119, %122 : vector<8x256xf32>
    %cst_36 = arith.constant 4.000000e-01 : f32
    %124 = vector.broadcast %cst_36 : f32 to vector<8x256xf32>
    %125 = arith.mulf %124, %108 : vector<8x256xf32>
    %126 = arith.addf %123, %125 : vector<8x256xf32>
    %c16_i32_37 = arith.constant 16 : i32
    %127 = tpu.dynamic_rotate %126 by %c16_i32_37 dim 1 : vector<8x256xf32>, i32 -> vector<8x256xf32>
    %128 = arith.select %15, %127, %126 : vector<8x256xi1>, vector<8x256xf32>
    %c32_i32_38 = arith.constant 32 : i32
    %129 = tpu.dynamic_rotate %126 by %c32_i32_38 dim 1 : vector<8x256xf32>, i32 -> vector<8x256xf32>
    %130 = arith.select %17, %129, %128 : vector<8x256xi1>, vector<8x256xf32>
    %c240_i32_39 = arith.constant 240 : i32
    %131 = tpu.dynamic_rotate %126 by %c240_i32_39 dim 1 : vector<8x256xf32>, i32 -> vector<8x256xf32>
    %132 = arith.select %19, %131, %126 : vector<8x256xi1>, vector<8x256xf32>
    %c224_i32_40 = arith.constant 224 : i32
    %133 = tpu.dynamic_rotate %126 by %c224_i32_40 dim 1 : vector<8x256xf32>, i32 -> vector<8x256xf32>
    %134 = arith.select %21, %133, %132 : vector<8x256xi1>, vector<8x256xf32>
    %135 = arith.addf %130, %134 : vector<8x256xf32>
    %cst_41 = arith.constant 5.000000e-02 : f32
    %136 = vector.broadcast %cst_41 : f32 to vector<8x256xf32>
    %137 = arith.mulf %136, %135 : vector<8x256xf32>
    %138 = arith.addf %128, %132 : vector<8x256xf32>
    %cst_42 = arith.constant 2.500000e-01 : f32
    %139 = vector.broadcast %cst_42 : f32 to vector<8x256xf32>
    %140 = arith.mulf %139, %138 : vector<8x256xf32>
    %141 = arith.addf %137, %140 : vector<8x256xf32>
    %cst_43 = arith.constant 4.000000e-01 : f32
    %142 = vector.broadcast %cst_43 : f32 to vector<8x256xf32>
    %143 = arith.mulf %142, %126 : vector<8x256xf32>
    %144 = arith.addf %141, %143 : vector<8x256xf32>
    %c1_i32_44 = arith.constant 1 : i32
    %145 = tpu.dynamic_rotate %144 by %c1_i32_44 dim 0 : vector<8x256xf32>, i32 -> vector<8x256xf32>
    %146 = arith.select %23, %145, %144 : vector<8x256xi1>, vector<8x256xf32>
    %c2_i32_45 = arith.constant 2 : i32
    %147 = tpu.dynamic_rotate %144 by %c2_i32_45 dim 0 : vector<8x256xf32>, i32 -> vector<8x256xf32>
    %148 = arith.select %25, %147, %146 : vector<8x256xi1>, vector<8x256xf32>
    %c7_i32_46 = arith.constant 7 : i32
    %149 = tpu.dynamic_rotate %144 by %c7_i32_46 dim 0 : vector<8x256xf32>, i32 -> vector<8x256xf32>
    %150 = arith.select %27, %149, %144 : vector<8x256xi1>, vector<8x256xf32>
    %c6_i32_47 = arith.constant 6 : i32
    %151 = tpu.dynamic_rotate %144 by %c6_i32_47 dim 0 : vector<8x256xf32>, i32 -> vector<8x256xf32>
    %152 = arith.select %29, %151, %150 : vector<8x256xi1>, vector<8x256xf32>
    %153 = arith.addf %148, %152 : vector<8x256xf32>
    %154 = arith.addf %146, %150 : vector<8x256xf32>
    %155 = arith.addf %153, %154 : vector<8x256xf32>
    %156 = arith.addf %155, %144 : vector<8x256xf32>
    %157 = arith.subf %59, %156 : vector<8x256xf32>
    %158 = vector.broadcast %52 : f32 to vector<8x256xf32>
    %159 = arith.mulf %157, %158 : vector<8x256xf32>
    %160 = arith.mulf %159, %159 : vector<8x256xf32>
    %cst_48 = arith.constant 9.99999997E-7 : f32
    %161 = vector.broadcast %cst_48 : f32 to vector<8x256xf32>
    %162 = arith.addf %160, %161 : vector<8x256xf32>
    %163 = math.sqrt %162 : vector<8x256xf32>
    %164 = arith.addf %47, %163 : vector<8x256xf32>
    %c1_i32_49 = arith.constant 1 : i32
    %c2_i32_50 = arith.constant 2 : i32
    %165 = arith.muli %arg0, %c2_i32_50 : i32
    %166 = arith.addi %165, %c1_i32_49 : i32
    %167 = arith.index_cast %166 : i32 to index
    %168 = memref.load %arg3[%167] : memref<2xf32, #tpu.memory_space<smem>>
    %cst_51 = arith.constant 1.000000e+01 : f32
    %169 = arith.mulf %cst_51, %168 : f32
    %170 = arith.index_cast %c1_i32_49 : i32 to index
    %c0_52 = arith.constant 0 : index
    %c0_53 = arith.constant 0 : index
    %171 = vector.load %arg1[%170, %c0_52, %c0_53] : memref<2x8x256xf32, #tpu.memory_space<vmem>>, vector<1x8x256xf32>
    %172 = vector.shape_cast %171 : vector<1x8x256xf32> to vector<8x256xf32>
    %173 = arith.index_cast %c1_i32_49 : i32 to index
    %c0_54 = arith.constant 0 : index
    %c0_55 = arith.constant 0 : index
    %174 = vector.load %arg2[%173, %c0_54, %c0_55] : memref<2x8x256xf32, #tpu.memory_space<vmem>>, vector<1x8x256xf32>
    %175 = vector.shape_cast %174 : vector<1x8x256xf32> to vector<8x256xf32>
    %176 = arith.subf %172, %175 : vector<8x256xf32>
    %c1_i32_56 = arith.constant 1 : i32
    %177 = tpu.dynamic_rotate %176 by %c1_i32_56 dim 1 : vector<8x256xf32>, i32 -> vector<8x256xf32>
    %178 = arith.select %7, %177, %176 : vector<8x256xi1>, vector<8x256xf32>
    %c2_i32_57 = arith.constant 2 : i32
    %179 = tpu.dynamic_rotate %176 by %c2_i32_57 dim 1 : vector<8x256xf32>, i32 -> vector<8x256xf32>
    %180 = arith.select %9, %179, %178 : vector<8x256xi1>, vector<8x256xf32>
    %c255_i32_58 = arith.constant 255 : i32
    %181 = tpu.dynamic_rotate %176 by %c255_i32_58 dim 1 : vector<8x256xf32>, i32 -> vector<8x256xf32>
    %182 = arith.select %11, %181, %176 : vector<8x256xi1>, vector<8x256xf32>
    %c254_i32_59 = arith.constant 254 : i32
    %183 = tpu.dynamic_rotate %176 by %c254_i32_59 dim 1 : vector<8x256xf32>, i32 -> vector<8x256xf32>
    %184 = arith.select %13, %183, %182 : vector<8x256xi1>, vector<8x256xf32>
    %185 = arith.addf %180, %184 : vector<8x256xf32>
    %cst_60 = arith.constant 5.000000e-02 : f32
    %186 = vector.broadcast %cst_60 : f32 to vector<8x256xf32>
    %187 = arith.mulf %186, %185 : vector<8x256xf32>
    %188 = arith.addf %178, %182 : vector<8x256xf32>
    %cst_61 = arith.constant 2.500000e-01 : f32
    %189 = vector.broadcast %cst_61 : f32 to vector<8x256xf32>
    %190 = arith.mulf %189, %188 : vector<8x256xf32>
    %191 = arith.addf %187, %190 : vector<8x256xf32>
    %cst_62 = arith.constant 4.000000e-01 : f32
    %192 = vector.broadcast %cst_62 : f32 to vector<8x256xf32>
    %193 = arith.mulf %192, %176 : vector<8x256xf32>
    %194 = arith.addf %191, %193 : vector<8x256xf32>
    %c16_i32_63 = arith.constant 16 : i32
    %195 = tpu.dynamic_rotate %194 by %c16_i32_63 dim 1 : vector<8x256xf32>, i32 -> vector<8x256xf32>
    %196 = arith.select %15, %195, %194 : vector<8x256xi1>, vector<8x256xf32>
    %c32_i32_64 = arith.constant 32 : i32
    %197 = tpu.dynamic_rotate %194 by %c32_i32_64 dim 1 : vector<8x256xf32>, i32 -> vector<8x256xf32>
    %198 = arith.select %17, %197, %196 : vector<8x256xi1>, vector<8x256xf32>
    %c240_i32_65 = arith.constant 240 : i32
    %199 = tpu.dynamic_rotate %194 by %c240_i32_65 dim 1 : vector<8x256xf32>, i32 -> vector<8x256xf32>
    %200 = arith.select %19, %199, %194 : vector<8x256xi1>, vector<8x256xf32>
    %c224_i32_66 = arith.constant 224 : i32
    %201 = tpu.dynamic_rotate %194 by %c224_i32_66 dim 1 : vector<8x256xf32>, i32 -> vector<8x256xf32>
    %202 = arith.select %21, %201, %200 : vector<8x256xi1>, vector<8x256xf32>
    %203 = arith.addf %198, %202 : vector<8x256xf32>
    %cst_67 = arith.constant 5.000000e-02 : f32
    %204 = vector.broadcast %cst_67 : f32 to vector<8x256xf32>
    %205 = arith.mulf %204, %203 : vector<8x256xf32>
    %206 = arith.addf %196, %200 : vector<8x256xf32>
    %cst_68 = arith.constant 2.500000e-01 : f32
    %207 = vector.broadcast %cst_68 : f32 to vector<8x256xf32>
    %208 = arith.mulf %207, %206 : vector<8x256xf32>
    %209 = arith.addf %205, %208 : vector<8x256xf32>
    %cst_69 = arith.constant 4.000000e-01 : f32
    %210 = vector.broadcast %cst_69 : f32 to vector<8x256xf32>
    %211 = arith.mulf %210, %194 : vector<8x256xf32>
    %212 = arith.addf %209, %211 : vector<8x256xf32>
    %c1_i32_70 = arith.constant 1 : i32
    %213 = tpu.dynamic_rotate %212 by %c1_i32_70 dim 0 : vector<8x256xf32>, i32 -> vector<8x256xf32>
    %214 = arith.select %23, %213, %212 : vector<8x256xi1>, vector<8x256xf32>
    %c2_i32_71 = arith.constant 2 : i32
    %215 = tpu.dynamic_rotate %212 by %c2_i32_71 dim 0 : vector<8x256xf32>, i32 -> vector<8x256xf32>
    %216 = arith.select %25, %215, %214 : vector<8x256xi1>, vector<8x256xf32>
    %c7_i32_72 = arith.constant 7 : i32
    %217 = tpu.dynamic_rotate %212 by %c7_i32_72 dim 0 : vector<8x256xf32>, i32 -> vector<8x256xf32>
    %218 = arith.select %27, %217, %212 : vector<8x256xi1>, vector<8x256xf32>
    %c6_i32_73 = arith.constant 6 : i32
    %219 = tpu.dynamic_rotate %212 by %c6_i32_73 dim 0 : vector<8x256xf32>, i32 -> vector<8x256xf32>
    %220 = arith.select %29, %219, %218 : vector<8x256xi1>, vector<8x256xf32>
    %221 = arith.addf %216, %220 : vector<8x256xf32>
    %222 = arith.addf %214, %218 : vector<8x256xf32>
    %223 = arith.addf %221, %222 : vector<8x256xf32>
    %224 = arith.addf %223, %212 : vector<8x256xf32>
    %225 = arith.mulf %224, %46 : vector<8x256xf32>
    %c1_i32_74 = arith.constant 1 : i32
    %226 = tpu.dynamic_rotate %225 by %c1_i32_74 dim 1 : vector<8x256xf32>, i32 -> vector<8x256xf32>
    %227 = arith.select %7, %226, %225 : vector<8x256xi1>, vector<8x256xf32>
    %c2_i32_75 = arith.constant 2 : i32
    %228 = tpu.dynamic_rotate %225 by %c2_i32_75 dim 1 : vector<8x256xf32>, i32 -> vector<8x256xf32>
    %229 = arith.select %9, %228, %227 : vector<8x256xi1>, vector<8x256xf32>
    %c255_i32_76 = arith.constant 255 : i32
    %230 = tpu.dynamic_rotate %225 by %c255_i32_76 dim 1 : vector<8x256xf32>, i32 -> vector<8x256xf32>
    %231 = arith.select %11, %230, %225 : vector<8x256xi1>, vector<8x256xf32>
    %c254_i32_77 = arith.constant 254 : i32
    %232 = tpu.dynamic_rotate %225 by %c254_i32_77 dim 1 : vector<8x256xf32>, i32 -> vector<8x256xf32>
    %233 = arith.select %13, %232, %231 : vector<8x256xi1>, vector<8x256xf32>
    %234 = arith.addf %229, %233 : vector<8x256xf32>
    %cst_78 = arith.constant 5.000000e-02 : f32
    %235 = vector.broadcast %cst_78 : f32 to vector<8x256xf32>
    %236 = arith.mulf %235, %234 : vector<8x256xf32>
    %237 = arith.addf %227, %231 : vector<8x256xf32>
    %cst_79 = arith.constant 2.500000e-01 : f32
    %238 = vector.broadcast %cst_79 : f32 to vector<8x256xf32>
    %239 = arith.mulf %238, %237 : vector<8x256xf32>
    %240 = arith.addf %236, %239 : vector<8x256xf32>
    %cst_80 = arith.constant 4.000000e-01 : f32
    %241 = vector.broadcast %cst_80 : f32 to vector<8x256xf32>
    %242 = arith.mulf %241, %225 : vector<8x256xf32>
    %243 = arith.addf %240, %242 : vector<8x256xf32>
    %c16_i32_81 = arith.constant 16 : i32
    %244 = tpu.dynamic_rotate %243 by %c16_i32_81 dim 1 : vector<8x256xf32>, i32 -> vector<8x256xf32>
    %245 = arith.select %15, %244, %243 : vector<8x256xi1>, vector<8x256xf32>
    %c32_i32_82 = arith.constant 32 : i32
    %246 = tpu.dynamic_rotate %243 by %c32_i32_82 dim 1 : vector<8x256xf32>, i32 -> vector<8x256xf32>
    %247 = arith.select %17, %246, %245 : vector<8x256xi1>, vector<8x256xf32>
    %c240_i32_83 = arith.constant 240 : i32
    %248 = tpu.dynamic_rotate %243 by %c240_i32_83 dim 1 : vector<8x256xf32>, i32 -> vector<8x256xf32>
    %249 = arith.select %19, %248, %243 : vector<8x256xi1>, vector<8x256xf32>
    %c224_i32_84 = arith.constant 224 : i32
    %250 = tpu.dynamic_rotate %243 by %c224_i32_84 dim 1 : vector<8x256xf32>, i32 -> vector<8x256xf32>
    %251 = arith.select %21, %250, %249 : vector<8x256xi1>, vector<8x256xf32>
    %252 = arith.addf %247, %251 : vector<8x256xf32>
    %cst_85 = arith.constant 5.000000e-02 : f32
    %253 = vector.broadcast %cst_85 : f32 to vector<8x256xf32>
    %254 = arith.mulf %253, %252 : vector<8x256xf32>
    %255 = arith.addf %245, %249 : vector<8x256xf32>
    %cst_86 = arith.constant 2.500000e-01 : f32
    %256 = vector.broadcast %cst_86 : f32 to vector<8x256xf32>
    %257 = arith.mulf %256, %255 : vector<8x256xf32>
    %258 = arith.addf %254, %257 : vector<8x256xf32>
    %cst_87 = arith.constant 4.000000e-01 : f32
    %259 = vector.broadcast %cst_87 : f32 to vector<8x256xf32>
    %260 = arith.mulf %259, %243 : vector<8x256xf32>
    %261 = arith.addf %258, %260 : vector<8x256xf32>
    %c1_i32_88 = arith.constant 1 : i32
    %262 = tpu.dynamic_rotate %261 by %c1_i32_88 dim 0 : vector<8x256xf32>, i32 -> vector<8x256xf32>
    %263 = arith.select %23, %262, %261 : vector<8x256xi1>, vector<8x256xf32>
    %c2_i32_89 = arith.constant 2 : i32
    %264 = tpu.dynamic_rotate %261 by %c2_i32_89 dim 0 : vector<8x256xf32>, i32 -> vector<8x256xf32>
    %265 = arith.select %25, %264, %263 : vector<8x256xi1>, vector<8x256xf32>
    %c7_i32_90 = arith.constant 7 : i32
    %266 = tpu.dynamic_rotate %261 by %c7_i32_90 dim 0 : vector<8x256xf32>, i32 -> vector<8x256xf32>
    %267 = arith.select %27, %266, %261 : vector<8x256xi1>, vector<8x256xf32>
    %c6_i32_91 = arith.constant 6 : i32
    %268 = tpu.dynamic_rotate %261 by %c6_i32_91 dim 0 : vector<8x256xf32>, i32 -> vector<8x256xf32>
    %269 = arith.select %29, %268, %267 : vector<8x256xi1>, vector<8x256xf32>
    %270 = arith.addf %265, %269 : vector<8x256xf32>
    %271 = arith.addf %263, %267 : vector<8x256xf32>
    %272 = arith.addf %270, %271 : vector<8x256xf32>
    %273 = arith.addf %272, %261 : vector<8x256xf32>
    %274 = arith.subf %176, %273 : vector<8x256xf32>
    %275 = vector.broadcast %169 : f32 to vector<8x256xf32>
    %276 = arith.mulf %274, %275 : vector<8x256xf32>
    %277 = arith.mulf %276, %276 : vector<8x256xf32>
    %cst_92 = arith.constant 9.99999997E-7 : f32
    %278 = vector.broadcast %cst_92 : f32 to vector<8x256xf32>
    %279 = arith.addf %277, %278 : vector<8x256xf32>
    %280 = math.sqrt %279 : vector<8x256xf32>
    %281 = arith.addf %164, %280 : vector<8x256xf32>
    %c2_i32_93 = arith.constant 2 : i32
    %cst_94 = arith.constant dense<0.000000e+00> : vector<256xf32>
    %282 = vector.multi_reduction <add>, %281, %cst_94 [0] : vector<8x256xf32> to vector<256xf32>
    %283 = vector.shape_cast %282 : vector<256xf32> to vector<1x256xf32>
    %c0_95 = arith.constant 0 : index
    %c0_96 = arith.constant 0 : index
    %c0_97 = arith.constant 0 : index
    %284 = vector.load %arg4[%c0_95, %c0_96, %c0_97] : memref<1x1x256xf32, #tpu.memory_space<vmem>>, vector<1x1x256xf32>
    %285 = vector.shape_cast %284 : vector<1x1x256xf32> to vector<1x256xf32>
    %286 = vector.shape_cast %283 : vector<1x256xf32> to vector<1x1x256xf32>
    tpu.vector_store %arg4[%c0_95, %c0_96, %c0_97], %286 {strides = array<i32>} : memref<1x1x256xf32, #tpu.memory_space<vmem>>, vector<1x1x256xf32>,
    return
  }
  func.func @transform_0(%arg0: i32) -> (i32, i32, i32) {
    %c0_i32 = arith.constant 0 : i32
    %c0_i32_0 = arith.constant 0 : i32
    %c0_i32_1 = arith.constant 0 : i32
    return %arg0, %c0_i32, %c0_i32_0 : i32, i32, i32
  }
  func.func @transform_1(%arg0: i32) -> (i32, i32, i32) {
    %c0_i32 = arith.constant 0 : i32
    %c0_i32_0 = arith.constant 0 : i32
    %c0_i32_1 = arith.constant 0 : i32
    return %arg0, %c0_i32, %c0_i32_0 : i32, i32, i32
  }
  func.func @transform_2(%arg0: i32) -> i32 {
    %c0_i32 = arith.constant 0 : i32
    %c0_i32_0 = arith.constant 0 : i32
    return %c0_i32 : i32
  }
  func.func @transform_3(%arg0: i32) -> (i32, i32, i32) {
    %c0_i32 = arith.constant 0 : i32
    %c0_i32_0 = arith.constant 0 : i32
    %c0_i32_1 = arith.constant 0 : i32
    return %arg0, %c0_i32, %c0_i32_0 : i32, i32, i32
  }
}

</mosaic_0001>

<bundles_post_ra>
// kernel: tpu_custom_call.1
= control target key start
LH: loop header
LB: loop body
LE: loop exit
PB: predicated region body
PF: predicated region fallthrough
CT: control target
= control target key end

     0   :  { %8 = vsyncpa [#allocation3], 0  ;;  %s1521_s0 = inlined_call_operand.hbm [shape: f32[2,8,256], index: 0, kind: input, shape index: {}]   ;;  %s1522_s1 = inlined_call_operand.hbm [shape: f32[2,8,256], index: 1, kind: input, shape index: {}]   ;;  %s1523_s2 = inlined_call_operand.vmem [shape: f32[2], index: 2, kind: input, shape index: {}]   ;;  %s1524_s3 = inlined_call_operand.hbm [shape: f32[1,1,256], index: 3, kind: output, shape index: {}]  }
   0x1   :  { %9 = vsyncpa [#allocation7], 0 }
   0x2   :  { %10 = vsyncpa [#allocation5], 0 }
   0x3   :  { %11 = vsyncpa [#allocation4], 0  ;;  %s809_s12 = smov [#allocation2]   ;;  %s723_s16 = scalar_lea.hbm %s1521_s0, 512 }
   0x4   :  { %s17_s13 = sshll.u32 %s809_s12, 4  ;;  %p724_p0 = scmp.ne.s32.totalorder %s1521_s0, %s723_s16  ;;  %s18_s13 = int_to_ptr.vmem [resolvable:$true] %s17_s13 }
   0x5   :  { %p727_p1 = scmp.lt.u32.totalorder %s723_s16, %s1521_s0 }
   0x7   :  { %p729_p2 = pnand %p727_p1, %p724_p0 }
   0x9   :  { %732 = shalt.err (!%p729_p2)
}
   0xa   :  { %s733_s21 = scalar_lea.vmem %s18_s13, 512  ;;  %p738_p4 = scmp.lt.s32.totalorder %s18_s13, %s18_s13 }
   0xb   :  { %p734_p3 = scmp.ne.s32.totalorder %s18_s13, %s733_s21  ;;  %p739_p5 = scmp.lt.s32.totalorder %s733_s21, %s733_s21 }
   0xd   :  { %p740_p6 = por %p739_p5, %p738_p4 }
   0xf   :  { %p741_p7 = pnand %p740_p6, %p734_p3 }
  0x11   :  { %744 = shalt.err (!%p741_p7)
}
  0x12   :  { %s810_s22 = smov 256   ;;  %s811_s23 = smov 16  }
  0x13   :  { %23 = dma.hbm_to_vmem [thread:$0]  %s1521_s0, 512, %s18_s13, [#allocation3], %s810_s22, %s810_s22, %s811_s23  }
  0x14   :  { %s812_s26 = smov [#allocation6]   ;;  %s42_s30 = sshll.u32 %s1523_s2, 4  ;;  %s43_s30 = int_to_ptr.vmem [resolvable:$true] %s42_s30 }
  0x15   :  { %s29_s27 = sshll.u32 %s812_s26, 4  ;;  %s745_s6 = scalar_lea.hbm %s1522_s1, 512  ;;  %s30_s27 = int_to_ptr.vmem [resolvable:$true] %s29_s27 }
  0x16   :  { %p746_p8 = scmp.ne.s32.totalorder %s1522_s1, %s745_s6  ;;  %p749_p9 = scmp.lt.u32.totalorder %s745_s6, %s1522_s1 }
  0x18   :  { %p751_p10 = pnand %p749_p9, %p746_p8 }
  0x1a   :  { %754 = shalt.err (!%p751_p10)
}
  0x1b   :  { %s755_s0 = scalar_lea.vmem %s30_s27, 512  ;;  %p760_p12 = scmp.lt.s32.totalorder %s30_s27, %s30_s27 }
  0x1c   :  { %p756_p11 = scmp.ne.s32.totalorder %s30_s27, %s755_s0  ;;  %p761_p13 = scmp.lt.s32.totalorder %s755_s0, %s755_s0 }
  0x1e   :  { %p762_p0 = por %p761_p13, %p760_p12 }
  0x20   :  { %p763_p1 = pnand %p762_p0, %p756_p11 }
  0x22   :  { %766 = shalt.err (!%p763_p1)
}
  0x23   :  { %35 = dma.hbm_to_vmem [thread:$0]  %s1522_s1, 512, %s30_s27, [#allocation7], %s810_s22, %s810_s22, %s811_s23  }
  0x24   :  { %s767_s12 = scalar_lea.vmem %s43_s30, 16  ;;  %p772_p3 = scmp.lt.s32.totalorder %s43_s30, %s43_s30 }
  0x25   :  { %p768_p2 = scmp.ne.s32.totalorder %s43_s30, %s767_s12  ;;  %p773_p4 = scmp.lt.s32.totalorder %s767_s12, %s767_s12 }
  0x27   :  { %p774_p5 = por %p773_p4, %p772_p3 }
  0x29   :  { %p775_p6 = pnand %p774_p5, %p768_p2 }
  0x2b   :  { %778 = shalt.err (!%p775_p6)
}
  0x2c   :  { %s813_s13 = smov [#allocation8]  }
  0x2d   :  { %45 = dma.vmem_to_smem %s43_s30, 16, %s813_s13, [#allocation5]  }
  0x2e   :  { %801 = dma.done.wait [#allocation3], 512  }
  0x2f   :  { %802 = vsyncadd [#allocation3], 4294966784 }
  0x30   :  { %803 = dma.done.wait [#allocation7], 512  }
  0x31   :  { %804 = vsyncadd [#allocation7], 4294966784 }
  0x32   :  { %805 = dma.done.wait [#allocation5], 16  }
  0x33   :  { %806 = vsyncadd [#allocation5], 4294967280 }
  0x34   :  { %55 = sfence }
  0x35   :  { %v104_v0 = vld [vmem:[#allocation2] sm:$0xff]  ;;  %v105_v2 = vld [vmem:[#allocation2 + $0x8] sm:$0xff]  ;;  %s814_s1 = smov 127   ;;  %s815_s14 = smov 1   ;;  %v382_v6 = vld [vmem:[#allocation2 + $0x18] sm:$0xff]  ;;  %v56_v12 = vlaneseq }
  0x36   :  { %v106_v1 = vld [vmem:[#allocation6] sm:$0xff]  ;;  %v107_v4 = vld [vmem:[#allocation6 + $0x8] sm:$0xff]  ;;  %v385_v7 = vld [vmem:[#allocation6 + $0x18] sm:$0xff]  ;;  %s816_s15 = smov 2   ;;  %s817_s16 = smov 126  }
  0x37   :  { %v873_v3 = vsub.f32 %v104_v0, %v106_v1  ;;  %v879_v5 = vsub.f32 %v105_v2, %v107_v4  ;;  %v381_v8 = vld [vmem:[#allocation2 + $0x10] sm:$0xff]  ;;  %v885_v10 = vsub.f32 %v382_v6, %v385_v7  ;;  %v914_v15 = vand.u32 127, %v56_v12  ;;  %s818_s17 = smov 112   ;;  %s819_s18 = smov 32  }
  0x38   :  { %v384_v9 = vld [vmem:[#allocation6 + $0x10] sm:$0xff]  ;;  %s820_s19 = smov 96   ;;  %s1454_s20 = sld [smem:[#allocation8]] }
  0x39   :  { %128 = vrot.lane.b32.xlu1 %v873_v3, %s814_s1  ;;  %110 = vrot.lane.b32.xlu0 %v873_v3, %s815_s14  ;;  %v887_v11 = vsub.f32 %v381_v8, %v384_v9  ;;  %v917_v18 = vadd.s32 128, %v914_v15  ;;  %v920_v21 = vand.u32 15, %v914_v15  ;;  %vm132_vm0 = vcmp.lt.s32.totalorder %v914_v15, 127  ;;  %s1483_s22 = sld [smem:[#allocation8 + $0x1]]  ;;  %s823_s24 = smov [#allocation9]  }
  0x3a   :  { %vm1541_vm1 = vcmp.lt.s32.totalorder %v914_v15, 1  ;;  %vm1530_vm6 = vcmp.lt.s32.totalorder %v914_v15, 2  ;;  %vm1529_vm9 = vcmp.lt.s32.totalorder %v914_v15, 126  ;;  %v157_v55 = vmul.f32 0.4, %v879_v5  ;;  %s688_s25 = sshll.u32 %s823_s24, 4  ;;  %s689_s25 = int_to_ptr.vmem [resolvable:$true] %s688_s25 }
  0x3b   :  { %v923_v22 = vand.u32 15, %v917_v18  ;;  %vm1540_vm2 = vcmp.le.s32.totalorder %v920_v21, 14  ;;  %vm1532_vm4 = vcmp.ge.s32.totalorder %v920_v21, 1  ;;  %vm1528_vm7 = vcmp.ge.s32.totalorder %v920_v21, 2  ;;  %s779_s26 = scalar_lea.vmem %s689_s25, 32  ;;  %p784_p8 = scmp.lt.s32.totalorder %s689_s25, %s689_s25 }
  0x3c   :  { %vm1526_vm10 = vcmp.le.s32.totalorder %v920_v21, 13  ;;  %v156_v56 = vmul.f32 0.4, %v873_v3  ;;  %vm1538_vm12 = vcmp.lt.s32.totalorder %v914_v15, 112  ;;  %vm1535_vm15 = vcmp.lt.s32.totalorder %v914_v15, 16  ;;  %p780_p7 = scmp.ne.s32.totalorder %s689_s25, %s779_s26  ;;  %p785_p9 = scmp.lt.s32.totalorder %s779_s26, %s779_s26 }
  0x3d   :  { %130 = vrot.lane.b32.xlu1 %v879_v5, %s814_s1  ;;  %112 = vrot.lane.b32.xlu0 %v879_v5, %s815_s14  ;;  %vm1539_vm3 = vcmp.le.s32.totalorder %v923_v22, 14  ;;  %vm1531_vm5 = vcmp.ge.s32.totalorder %v923_v22, 1  ;;  %vm1527_vm8 = vcmp.ge.s32.totalorder %v923_v22, 2  ;;  %vm1525_vm11 = vcmp.le.s32.totalorder %v923_v22, 13 }
  0x3e   :  { %s103_s21 = smul.f32 10.0, %s1454_s20  ;;  %p786_p10 = por %p785_p9, %p784_p8 }
  0x40   :  { %p787_p11 = pnand %p786_p10, %p780_p7 }
  0x41   :  { %390 = vrot.lane.b32.xlu1 %v885_v10, %s815_s14  ;;  %388 = vrot.lane.b32.xlu0 %v887_v11, %s815_s14 }
  0x45   :  { %406 = vrot.lane.b32.xlu1 %v885_v10, %s814_s1  ;;  %404 = vrot.lane.b32.xlu0 %v887_v11, %s814_s1 }
  0x49   :  { %121 = vrot.lane.b32.xlu1 %v879_v5, %s816_s15  ;;  %119 = vrot.lane.b32.xlu0 %v873_v3, %s816_s15 }
  0x4d   :  { %139 = vrot.lane.b32.xlu1 %v879_v5, %s817_s16  ;;  %137 = vrot.lane.b32.xlu0 %v873_v3, %s817_s16 }
  0x51   :  { %398 = vrot.lane.b32.xlu1 %v885_v10, %s816_s15  ;;  %396 = vrot.lane.b32.xlu0 %v887_v11, %s816_s15 }
  0x55   :  { %414 = vrot.lane.b32.xlu1 %v885_v10, %s817_s16  ;;  %412 = vrot.lane.b32.xlu0 %v887_v11, %s817_s16 }
  0xab   :  { %v129_v13 = vpop.permute.xlu1 %128  ;;  %v111_v14 = vpop.permute.xlu0 %110 }
  0xaf   :  { %v131_v16 = vpop.permute.xlu1 %130  ;;  %v113_v17 = vpop.permute.xlu0 %112 }
  0xb0   :  { %v133_v25 = vsel %vm132_vm0, %v129_v13, %v131_v16  ;;  %v134_v26 = vsel %vm132_vm0, %v131_v16, %v129_v13  ;;  %v115_v27 = vsel %vm1541_vm1, %v111_v14, %v113_v17  ;;  %v116_v28 = vsel %vm1541_vm1, %v113_v17, %v111_v14 }
  0xb1   :  { %v135_v31 = vsel %vm1540_vm2, %v133_v25, %v873_v3  ;;  %v136_v32 = vsel %vm1539_vm3, %v134_v26, %v879_v5  ;;  %v117_v33 = vsel %vm1532_vm4, %v116_v28, %v873_v3  ;;  %v118_v34 = vsel %vm1531_vm5, %v115_v27, %v879_v5 }
  0xb2   :  { %v150_v37 = vadd.f32 %v135_v31, %v117_v33  ;;  %v151_v38 = vadd.f32 %v136_v32, %v118_v34  ;;  %v430_v28 = vmul.f32 0.4, %v887_v11 }
  0xb3   :  { %v391_v19 = vpop.permute.xlu1 %390  ;;  %v389_v20 = vpop.permute.xlu0 %388 }
  0xb4   :  { %v392_v49 = vsel %vm1541_vm1, %v389_v20, %v391_v19  ;;  %v393_v50 = vsel %vm1541_vm1, %v391_v19, %v389_v20  ;;  %v152_v53 = vmul.f32 0.25, %v150_v37  ;;  %v153_v54 = vmul.f32 0.25, %v151_v38 }
  0xb5   :  { %v394_v63 = vsel %vm1532_vm4, %v393_v50, %v887_v11  ;;  %v395_v0 = vsel %vm1531_vm5, %v392_v49, %v885_v10  ;;  %vm191_vm4 = vcmp.lt.s32.totalorder %v914_v15, 96 }
  0xb7   :  { %v407_v23 = vpop.permute.xlu1 %406  ;;  %v405_v24 = vpop.permute.xlu0 %404 }
  0xb8   :  { %v408_v41 = vsel %vm132_vm0, %v405_v24, %v407_v23  ;;  %v409_v42 = vsel %vm132_vm0, %v407_v23, %v405_v24 }
  0xb9   :  { %v410_v59 = vsel %vm1540_vm2, %v408_v41, %v887_v11  ;;  %v411_v60 = vsel %vm1539_vm3, %v409_v42, %v885_v10  ;;  %v1054_v42 = vshra.s32 %v914_v15, 4 }
  0xba   :  { %v424_v7 = vadd.f32 %v410_v59, %v394_v63  ;;  %v425_v8 = vadd.f32 %v411_v60, %v395_v0 }
  0xbb   :  { %v122_v29 = vpop.permute.xlu1 %121  ;;  %v120_v30 = vpop.permute.xlu0 %119  ;;  %vm1537_vm13 = vcmp.ge.s32.totalorder %v1054_v42, 1 }
  0xbc   :  { %v124_v35 = vsel %vm1530_vm6, %v120_v30, %v122_v29  ;;  %v125_v36 = vsel %vm1530_vm6, %v122_v29, %v120_v30  ;;  %v431_v29 = vmul.f32 0.4, %v885_v10  ;;  %v426_v30 = vmul.f32 0.25, %v424_v7 }
  0xbd   :  { %v126_v45 = vsel %vm1528_vm7, %v125_v36, %v117_v33  ;;  %v127_v46 = vsel %vm1527_vm8, %v124_v35, %v118_v34 }
  0xbf   :  { %v140_v39 = vpop.permute.xlu1 %139  ;;  %v138_v40 = vpop.permute.xlu0 %137 }
  0xc0   :  { %v142_v43 = vsel %vm1529_vm9, %v138_v40, %v140_v39  ;;  %v143_v44 = vsel %vm1529_vm9, %v140_v39, %v138_v40 }
  0xc1   :  { %v144_v47 = vsel %vm1526_vm10, %v142_v43, %v135_v31  ;;  %v145_v48 = vsel %vm1525_vm11, %v143_v44, %v136_v32  ;;  %v427_v31 = vmul.f32 0.25, %v425_v8  ;;  %v1057_v43 = vshra.s32 %v917_v18, 4 }
  0xc2   :  { %v146_v51 = vadd.f32 %v144_v47, %v126_v45  ;;  %v147_v52 = vadd.f32 %v145_v48, %v127_v46 }
  0xc3   :  { %v399_v57 = vpop.permute.xlu1 %398  ;;  %v397_v58 = vpop.permute.xlu0 %396  ;;  %vm1536_vm14 = vcmp.ge.s32.totalorder %v1057_v43, 1  ;;  %vm1543_vm5 = vcmp.le.s32.totalorder %v1057_v43, 13 }
  0xc4   :  { %v148_v61 = vmul.f32 0.05, %v146_v51  ;;  %v149_v62 = vmul.f32 0.05, %v147_v52  ;;  %v400_v4 = vsel %vm1530_vm6, %v397_v58, %v399_v57  ;;  %v401_v6 = vsel %vm1530_vm6, %v399_v57, %v397_v58 }
  0xc5   :  { %v402_v20 = vsel %vm1528_vm7, %v401_v6, %v394_v63  ;;  %v403_v23 = vsel %vm1527_vm8, %v400_v4, %v395_v0  ;;  %vm173_vm8 = vcmp.lt.s32.totalorder %v914_v15, 32  ;;  %vm75_vm7 = vcmp.ge.s32.totalorder %v1054_v42, 2 }
  0xc6   :  { %v154_v1 = vadd.f32 %v152_v53, %v148_v61  ;;  %v155_v2 = vadd.f32 %v153_v54, %v149_v62  ;;  %vm79_vm6 = vcmp.le.s32.totalorder %v1054_v42, 13  ;;  %v1080_v51 = vshrl.u32 %v56_v12, 7 }
  0xc7   :  { %v415_v9 = vpop.permute.xlu1 %414  ;;  %v413_v13 = vpop.permute.xlu0 %412  ;;  %v88_v62 = vand.u32 1, %v1057_v43  ;;  %v87_v63 = vand.u32 1, %v1054_v42 }
  0xc8   :  { %v999_v14 = vadd.f32 %v156_v56, %v154_v1  ;;  %v1001_v16 = vadd.f32 %v157_v55, %v155_v2  ;;  %v416_v17 = vsel %vm1529_vm9, %v413_v13, %v415_v9  ;;  %v417_v19 = vsel %vm1529_vm9, %v415_v9, %v413_v13 }
  0xc9   :  { %v418_v24 = vsel %vm1526_vm10, %v416_v17, %v410_v59  ;;  %v419_v25 = vsel %vm1525_vm11, %v417_v19, %v411_v60  ;;  %vm1534_vm11 = vcmp.le.s32.totalorder %v1054_v42, 14  ;;  %vm1533_vm10 = vcmp.le.s32.totalorder %v1057_v43, 14 }
  0xca   :  { %v420_v26 = vadd.f32 %v418_v24, %v402_v20  ;;  %v421_v27 = vadd.f32 %v419_v25, %v403_v23  ;;  %160 = vrot.lane.b32.xlu0 %v999_v14, %s811_s23  ;;  %162 = vrot.lane.b32.xlu1 %v1001_v16, %s811_s23  ;;  %v1066_v48 = vmul.f32 0.4, %v999_v14  ;;  %v1074_v50 = vmul.f32 0.4, %v1001_v16 }
  0xcb   :  { %vm1542_vm9 = vcmp.ge.s32.totalorder %v1057_v43, 2  ;;  %v85_v59 = vand.u32 1, %v1080_v51  ;;  %vm1156_vm3 = vcmp.eq.s32.totalorder %v87_v63, 0 }
  0xcc   :  { %v422_v32 = vmul.f32 0.05, %v420_v26  ;;  %v423_v33 = vmul.f32 0.05, %v421_v27 }
  0xce   :  { %v428_v34 = vadd.f32 %v426_v30, %v422_v32  ;;  %v429_v35 = vadd.f32 %v427_v31, %v423_v33  ;;  %178 = vrot.lane.b32.xlu0 %v999_v14, %s818_s17  ;;  %180 = vrot.lane.b32.xlu1 %v1001_v16, %s818_s17 }
  0xd0   :  { %v1025_v36 = vadd.f32 %v430_v28, %v428_v34  ;;  %v1027_v37 = vadd.f32 %v431_v29, %v429_v35  ;;  %v94_v35 = vand.u32 1, %v923_v22 }
  0xd2   :  { %434 = vrot.lane.b32.xlu0 %v1025_v36, %s811_s23  ;;  %436 = vrot.lane.b32.xlu1 %v1027_v37, %s811_s23  ;;  %v1095_v58 = vmul.f32 0.4, %v1025_v36  ;;  %vm1164_vm2 = vcmp.eq.s32.totalorder %v94_v35, 0 }
  0xd6   :  { %450 = vrot.lane.b32.xlu0 %v1025_v36, %s818_s17  ;;  %452 = vrot.lane.b32.xlu1 %v1027_v37, %s818_s17 }
  0xda   :  { %169 = vrot.lane.b32.xlu0 %v999_v14, %s819_s18  ;;  %171 = vrot.lane.b32.xlu1 %v1001_v16, %s819_s18 }
  0xde   :  { %187 = vrot.lane.b32.xlu0 %v999_v14, %s820_s19  ;;  %189 = vrot.lane.b32.xlu1 %v1001_v16, %s820_s19 }
  0xe2   :  { %442 = vrot.lane.b32.xlu0 %v1025_v36, %s819_s18  ;;  %444 = vrot.lane.b32.xlu1 %v1027_v37, %s819_s18 }
  0xe6   :  { %458 = vrot.lane.b32.xlu0 %v1025_v36, %s820_s19  ;;  %460 = vrot.lane.b32.xlu1 %v1027_v37, %s820_s19 }
 0x13c   :  { %v161_v38 = vpop.permute.xlu0 %160  ;;  %v163_v39 = vpop.permute.xlu1 %162 }
 0x13d   :  { %v165_v52 = vsel %vm1535_vm15, %v161_v38, %v163_v39  ;;  %v166_v53 = vsel %vm1535_vm15, %v163_v39, %v161_v38  ;;  %v93_v38 = vand.u32 1, %v920_v21 }
 0x13e   :  { %v167_v0 = vsel %vm1537_vm13, %v166_v53, %v999_v14  ;;  %v168_v1 = vsel %vm1536_vm14, %v165_v52, %v1001_v16 }
 0x13f   :  { %vm1168_vm1 = vcmp.eq.s32.totalorder %v93_v38, 0 }
 0x140   :  { %v179_v40 = vpop.permute.xlu0 %178  ;;  %v181_v41 = vpop.permute.xlu1 %180 }
 0x141   :  { %v183_v18 = vsel %vm1538_vm12, %v179_v40, %v181_v41  ;;  %v184_v49 = vsel %vm1538_vm12, %v181_v41, %v179_v40 }
 0x142   :  { %v185_v56 = vsel %vm1534_vm11, %v183_v18, %v999_v14  ;;  %v186_v57 = vsel %vm1533_vm10, %v184_v49, %v1001_v16 }
 0x143   :  { %v200_v6 = vadd.f32 %v185_v56, %v167_v0  ;;  %v201_v7 = vadd.f32 %v186_v57, %v168_v1 }
 0x144   :  { %v435_v44 = vpop.permute.xlu0 %434  ;;  %v437_v45 = vpop.permute.xlu1 %436 }
 0x145   :  { %v438_v8 = vsel %vm1535_vm15, %v435_v44, %v437_v45  ;;  %v439_v9 = vsel %vm1535_vm15, %v437_v45, %v435_v44  ;;  %vm83_vm15 = vcmp.le.s32.totalorder %v1080_v51, 6  ;;  %v202_v39 = vmul.f32 0.25, %v200_v6 }
 0x146   :  { %v440_v27 = vsel %vm1537_vm13, %v439_v9, %v1025_v36  ;;  %v441_v28 = vsel %vm1536_vm14, %v438_v8, %v1027_v37  ;;  %vm84_vm14 = vcmp.le.s32.totalorder %v1080_v51, 5  ;;  %vm1148_vm13 = vcmp.eq.s32.totalorder %v85_v59, 0 }
 0x148   :  { %v451_v46 = vpop.permute.xlu0 %450  ;;  %v453_v47 = vpop.permute.xlu1 %452 }
 0x149   :  { %v454_v60 = vsel %vm1538_vm12, %v451_v46, %v453_v47  ;;  %v455_v61 = vsel %vm1538_vm12, %v453_v47, %v451_v46  ;;  %vm1152_vm12 = vcmp.eq.s32.totalorder %v88_v62, 0 }
 0x14a   :  { %v456_v16 = vsel %vm1534_vm11, %v454_v60, %v1025_v36  ;;  %v457_v17 = vsel %vm1533_vm10, %v455_v61, %v1027_v37  ;;  %vm81_vm10 = vcmp.ge.s32.totalorder %v1080_v51, 1  ;;  %vm82_vm11 = vcmp.ge.s32.totalorder %v1080_v51, 2 }
 0x14b   :  { %v470_v31 = vadd.f32 %v456_v16, %v440_v27  ;;  %v471_v32 = vadd.f32 %v457_v17, %v441_v28  ;;  %v203_v36 = vmul.f32 0.25, %v201_v7 }
 0x14c   :  { %v170_v54 = vpop.permute.xlu0 %169  ;;  %v172_v55 = vpop.permute.xlu1 %171 }
 0x14d   :  { %v174_v2 = vsel %vm173_vm8, %v170_v54, %v172_v55  ;;  %v175_v4 = vsel %vm173_vm8, %v172_v55, %v170_v54  ;;  %v472_v53 = vmul.f32 0.25, %v470_v31  ;;  %v473_v54 = vmul.f32 0.25, %v471_v32 }
 0x14e   :  { %v176_v23 = vsel %vm75_vm7, %v175_v4, %v167_v0  ;;  %v177_v24 = vsel %vm1542_vm9, %v174_v2, %v168_v1  ;;  %v477_v31 = vmul.f32 0.4, %v1027_v37  ;;  %v821_v37 = vmov 0.0  }
 0x150   :  { %v188_v13 = vpop.permute.xlu0 %187  ;;  %v190_v14 = vpop.permute.xlu1 %189 }
 0x151   :  { %v192_v19 = vsel %vm191_vm4, %v188_v13, %v190_v14  ;;  %v193_v20 = vsel %vm191_vm4, %v190_v14, %v188_v13 }
 0x152   :  { %v194_v25 = vsel %vm79_vm6, %v192_v19, %v185_v56  ;;  %v195_v26 = vsel %vm1543_vm5, %v193_v20, %v186_v57 }
 0x153   :  { %v196_v29 = vadd.f32 %v194_v25, %v176_v23  ;;  %v197_v30 = vadd.f32 %v195_v26, %v177_v24 }
 0x154   :  { %v443_v33 = vpop.permute.xlu0 %442  ;;  %v445_v34 = vpop.permute.xlu1 %444 }
 0x155   :  { %v198_v40 = vmul.f32 0.05, %v196_v29  ;;  %v199_v41 = vmul.f32 0.05, %v197_v30  ;;  %v446_v49 = vsel %vm173_vm8, %v443_v33, %v445_v34  ;;  %v447_v52 = vsel %vm173_vm8, %v445_v34, %v443_v33 }
 0x156   :  { %v448_v0 = vsel %vm75_vm7, %v447_v52, %v440_v27  ;;  %v449_v1 = vsel %vm1542_vm9, %v446_v49, %v441_v28  ;;  %vm92_vm9 = vmand %vm1148_vm13, %vm1152_vm12 }
 0x157   :  { %v204_v47 = vadd.f32 %v202_v39, %v198_v40  ;;  %v205_v18 = vadd.f32 %v203_v36, %v199_v41  ;;  %vm98_vm12 = vmand %vm92_vm9, %vm1164_vm2  ;;  %vm1557_vm9 = vcmp.le.s32.totalorder %v923_v22, 14 }
 0x158   :  { %v459_v55 = vpop.permute.xlu0 %458  ;;  %v461_v56 = vpop.permute.xlu1 %460  ;;  %v100_v45 = vsel %vm98_vm12, 4.0, %v821_v37  ;;  %vm1559_vm12 = vcmp.ge.s32.totalorder %v923_v22, 1 }
 0x159   :  { %v208_v60 = vadd.f32 %v1066_v48, %v204_v47  ;;  %v209_v61 = vadd.f32 %v1074_v50, %v205_v18  ;;  %v462_v62 = vsel %vm191_vm4, %v459_v55, %v461_v56  ;;  %v463_v63 = vsel %vm191_vm4, %v461_v56, %v459_v55 }
 0x15a   :  { %v464_v2 = vsel %vm79_vm6, %v462_v62, %v456_v16  ;;  %v465_v48 = vsel %vm1543_vm5, %v463_v63, %v457_v17  ;;  %vm91_vm5 = vmand %vm1148_vm13, %vm1156_vm3  ;;  %vm1558_vm13 = vcmp.ge.s32.totalorder %v920_v21, 1 }
 0x15b   :  { %v210_v4 = vrot.slane %v208_v60, 7  ;;  %v211_v50 = vrot.slane %v209_v61, 7  ;;  %v214_v6 = vrot.slane %v208_v60, 6  ;;  %v215_v7 = vrot.slane %v209_v61, 6  ;;  %vm97_vm3 = vmand %vm91_vm5, %vm1168_vm1 }
 0x15c   :  { %v218_v8 = vrot.slane %v208_v60, 1  ;;  %v219_v9 = vrot.slane %v209_v61, 1  ;;  %v222_v13 = vrot.slane %v208_v60, 2  ;;  %v223_v14 = vrot.slane %v209_v61, 2 }
 0x15d   :  { %v466_v19 = vadd.f32 %v464_v2, %v448_v0  ;;  %v467_v20 = vadd.f32 %v465_v48, %v449_v1  ;;  %v213_v16 = vsel %vm81_vm10, %v211_v50, %v209_v61  ;;  %v212_v17 = vsel %vm81_vm10, %v210_v4, %v208_v60 }
 0x15e   :  { %v217_v23 = vsel %vm82_vm11, %v215_v7, %v213_v16  ;;  %v221_v24 = vsel %vm83_vm15, %v219_v9, %v209_v61  ;;  %v216_v25 = vsel %vm82_vm11, %v214_v6, %v212_v17  ;;  %v220_v26 = vsel %vm83_vm15, %v218_v8, %v208_v60 }
 0x15f   :  { %v468_v27 = vmul.f32 0.05, %v466_v19  ;;  %v469_v28 = vmul.f32 0.05, %v467_v20  ;;  %v225_v29 = vsel %vm84_vm14, %v223_v14, %v221_v24  ;;  %v229_v30 = vadd.f32 %v221_v24, %v213_v16 }
 0x160   :  { %v227_v32 = vadd.f32 %v225_v29, %v217_v23  ;;  %v224_v33 = vsel %vm84_vm14, %v222_v13, %v220_v26  ;;  %v228_v34 = vadd.f32 %v220_v26, %v212_v17  ;;  %v99_v47 = vsel %vm97_vm3, 4.0, %v821_v37 }
 0x161   :  { %v474_v35 = vadd.f32 %v472_v53, %v468_v27  ;;  %v475_v38 = vadd.f32 %v473_v54, %v469_v28  ;;  %v226_v39 = vadd.f32 %v224_v33, %v216_v25  ;;  %vm1554_vm1 = vcmp.lt.s32.totalorder %v914_v15, 1 }
 0x162   :  { %v231_v36 = vadd.f32 %v229_v30, %v227_v32  ;;  %vm1555_vm2 = vmmov %vm1554_vm1  ;;  %vm1556_vm5 = vcmp.le.s32.totalorder %v920_v21, 14  ;;  %vm1560_vm3 = vcmp.lt.s32.totalorder %v914_v15, 2 }
 0x163   :  { %v478_v40 = vadd.f32 %v1095_v58, %v474_v35  ;;  %v479_v41 = vadd.f32 %v477_v31, %v475_v38  ;;  %v230_v44 = vadd.f32 %v228_v34, %v226_v39 }
 0x164   :  { %v233_v46 = vadd.f32 %v231_v36, %v209_v61 }
 0x165   :  { %v480_v18 = vrot.slane %v478_v40, 7  ;;  %v481_v49 = vrot.slane %v479_v41, 7  ;;  %v484_v52 = vrot.slane %v478_v40, 6  ;;  %v485_v55 = vrot.slane %v479_v41, 6 }
 0x166   :  { %v488_v56 = vrot.slane %v478_v40, 1  ;;  %v489_v53 = vrot.slane %v479_v41, 1  ;;  %v492_v54 = vrot.slane %v478_v40, 2  ;;  %v493_v57 = vrot.slane %v479_v41, 2 }
 0x167   :  { %v1216_v59 = vmul.f32 %v233_v46, %v100_v45  ;;  %v232_v62 = vadd.f32 %v230_v44, %v208_v60  ;;  %v483_v58 = vsel %vm81_vm10, %v481_v49, %v479_v41  ;;  %v482_v63 = vsel %vm81_vm10, %v480_v18, %v478_v40 }
 0x168   :  { %v487_v61 = vsel %vm82_vm11, %v485_v55, %v483_v58  ;;  %v491_v0 = vsel %vm83_vm15, %v489_v53, %v479_v41  ;;  %v486_v1 = vsel %vm82_vm11, %v484_v52, %v482_v63  ;;  %v490_v2 = vsel %vm83_vm15, %v488_v56, %v478_v40 }
 0x169   :  { %238 = vrot.lane.b32.xlu1 %v1216_v59, %s815_s14  ;;  %v1232_v60 = vmul.f32 %v232_v62, %v99_v47  ;;  %v495_v48 = vsel %vm84_vm14, %v493_v57, %v491_v0  ;;  %v499_v4 = vadd.f32 %v491_v0, %v483_v58  ;;  %v494_v50 = vsel %vm84_vm14, %v492_v54, %v490_v2 }
 0x16a   :  { %v497_v6 = vadd.f32 %v495_v48, %v487_v61  ;;  %v496_v7 = vadd.f32 %v494_v50, %v486_v1  ;;  %v498_v8 = vadd.f32 %v490_v2, %v482_v63 }
 0x16b   :  { %236 = vrot.lane.b32.xlu0 %v1232_v60, %s815_s14 }
 0x16c   :  { %v501_v9 = vadd.f32 %v499_v4, %v497_v6  ;;  %v500_v13 = vadd.f32 %v498_v8, %v496_v7 }
 0x16d   :  { %254 = vrot.lane.b32.xlu1 %v1216_v59, %s814_s1 }
 0x16e   :  { %v503_v14 = vadd.f32 %v501_v9, %v479_v41  ;;  %v502_v19 = vadd.f32 %v500_v13, %v478_v40  ;;  %v279_v13 = vmul.f32 0.4, %v1216_v59 }
 0x16f   :  { %252 = vrot.lane.b32.xlu0 %v1232_v60, %s814_s1 }
 0x170   :  { %v1244_v20 = vmul.f32 %v503_v14, %v100_v45  ;;  %v1246_v16 = vmul.f32 %v502_v19, %v99_v47  ;;  %v278_v14 = vmul.f32 0.4, %v1232_v60 }
 0x172   :  { %508 = vrot.lane.b32.xlu1 %v1244_v20, %s815_s14 }
 0x173   :  { %506 = vrot.lane.b32.xlu0 %v1246_v16, %s815_s14 }
 0x176   :  { %524 = vrot.lane.b32.xlu1 %v1244_v20, %s814_s1 }
 0x177   :  { %522 = vrot.lane.b32.xlu0 %v1246_v16, %s814_s1 }
 0x17a   :  { %246 = vrot.lane.b32.xlu1 %v1216_v59, %s816_s15 }
 0x17b   :  { %244 = vrot.lane.b32.xlu0 %v1232_v60, %s816_s15 }
 0x17e   :  { %262 = vrot.lane.b32.xlu1 %v1216_v59, %s817_s16 }
 0x17f   :  { %260 = vrot.lane.b32.xlu0 %v1232_v60, %s817_s16 }
 0x182   :  { %516 = vrot.lane.b32.xlu1 %v1244_v20, %s816_s15 }
 0x183   :  { %514 = vrot.lane.b32.xlu0 %v1246_v16, %s816_s15 }
 0x186   :  { %532 = vrot.lane.b32.xlu1 %v1244_v20, %s817_s16 }
 0x187   :  { %530 = vrot.lane.b32.xlu0 %v1246_v16, %s817_s16 }
 0x1db   :  { %v239_v17 = vpop.permute.xlu1 %238 }
 0x1dd   :  { %v237_v23 = vpop.permute.xlu0 %236 }
 0x1de   :  { %v240_v33 = vsel %vm1554_vm1, %v237_v23, %v239_v17  ;;  %v241_v34 = vsel %vm1555_vm2, %v239_v17, %v237_v23  ;;  %vm1561_vm1 = vmmov %vm1560_vm3  ;;  %vm1562_vm2 = vcmp.lt.s32.totalorder %v914_v15, 126 }
 0x1df   :  { %v255_v24 = vpop.permute.xlu1 %254  ;;  %v242_v36 = vsel %vm1558_vm13, %v241_v34, %v1232_v60  ;;  %v243_v40 = vsel %vm1559_vm12, %v240_v33, %v1216_v59  ;;  %vm1565_vm13 = vcmp.ge.s32.totalorder %v923_v22, 2  ;;  %vm1566_vm12 = vcmp.le.s32.totalorder %v920_v21, 13 }
 0x1e1   :  { %v253_v25 = vpop.permute.xlu0 %252 }
 0x1e2   :  { %v256_v30 = vsel %vm132_vm0, %v253_v25, %v255_v24  ;;  %v257_v31 = vsel %vm132_vm0, %v255_v24, %v253_v25 }
 0x1e3   :  { %v258_v38 = vsel %vm1556_vm5, %v256_v30, %v1232_v60  ;;  %v259_v39 = vsel %vm1557_vm9, %v257_v31, %v1216_v59  ;;  %vm1563_vm5 = vmmov %vm1562_vm2  ;;  %vm1564_vm9 = vcmp.ge.s32.totalorder %v920_v21, 2 }
 0x1e4   :  { %v509_v26 = vpop.permute.xlu1 %508  ;;  %v272_v45 = vadd.f32 %v258_v38, %v242_v36  ;;  %v273_v46 = vadd.f32 %v259_v39, %v243_v40 }
 0x1e5   :  { %v507_v27 = vpop.permute.xlu0 %506 }
 0x1e6   :  { %v274_v1 = vmul.f32 0.25, %v272_v45  ;;  %v275_v2 = vmul.f32 0.25, %v273_v46 }
 0x1e8   :  { %v525_v28 = vpop.permute.xlu1 %524 }
 0x1e9   :  { %v523_v29 = vpop.permute.xlu0 %522 }
 0x1ea   :  { %v526_v18 = vsel %vm132_vm0, %v523_v29, %v525_v28  ;;  %v527_v49 = vsel %vm132_vm0, %v525_v28, %v523_v29  ;;  %vm1568_vm0 = vcmp.lt.s32.totalorder %v914_v15, 1 }
 0x1eb   :  { %v510_v62 = vsel %vm1568_vm0, %v507_v27, %v509_v26 }
 0x1ec   :  { %v247_v32 = vpop.permute.xlu1 %246 }
 0x1ed   :  { %v245_v35 = vpop.permute.xlu0 %244 }
 0x1ee   :  { %v248_v41 = vsel %vm1560_vm3, %v245_v35, %v247_v32  ;;  %v249_v44 = vsel %vm1561_vm1, %v247_v32, %v245_v35  ;;  %vm1567_vm3 = vcmp.le.s32.totalorder %v923_v22, 13  ;;  %vm1569_vm1 = vmmov %vm1568_vm0  ;;  %vm1576_vm0 = vcmp.lt.s32.totalorder %v914_v15, 126 }
 0x1ef   :  { %v250_v56 = vsel %vm1564_vm9, %v249_v44, %v242_v36  ;;  %v251_v53 = vsel %vm1565_vm13, %v248_v41, %v243_v40  ;;  %v511_v58 = vsel %vm1569_vm1, %v509_v26, %v507_v27  ;;  %vm1572_vm9 = vcmp.ge.s32.totalorder %v920_v21, 1  ;;  %vm1577_vm1 = vmmov %vm1576_vm0 }
 0x1f0   :  { %v263_v37 = vpop.permute.xlu1 %262  ;;  %v512_v8 = vsel %vm1572_vm9, %v511_v58, %v1246_v16  ;;  %vm1573_vm13 = vcmp.ge.s32.totalorder %v923_v22, 1  ;;  %vm1580_vm9 = vcmp.le.s32.totalorder %v920_v21, 13  ;;  %v548_v44 = vmul.f32 0.4, %v1246_v16 }
 0x1f1   :  { %v261_v47 = vpop.permute.xlu0 %260  ;;  %v513_v9 = vsel %vm1573_vm13, %v510_v62, %v1244_v20  ;;  %vm1581_vm13 = vcmp.le.s32.totalorder %v923_v22, 13 }
 0x1f2   :  { %v264_v52 = vsel %vm1562_vm2, %v261_v47, %v263_v37  ;;  %v265_v55 = vsel %vm1563_vm5, %v263_v37, %v261_v47  ;;  %vm1570_vm2 = vcmp.le.s32.totalorder %v920_v21, 14  ;;  %vm1571_vm5 = vcmp.le.s32.totalorder %v923_v22, 14 }
 0x1f3   :  { %v266_v54 = vsel %vm1566_vm12, %v264_v52, %v258_v38  ;;  %v267_v57 = vsel %vm1567_vm3, %v265_v55, %v259_v39  ;;  %v528_v4 = vsel %vm1570_vm2, %v526_v18, %v1246_v16  ;;  %v529_v50 = vsel %vm1571_vm5, %v527_v49, %v1244_v20 }
 0x1f4   :  { %v268_v63 = vadd.f32 %v266_v54, %v250_v56  ;;  %v269_v61 = vadd.f32 %v267_v57, %v251_v53  ;;  %v517_v0 = vpop.permute.xlu1 %516  ;;  %vm1574_vm12 = vcmp.lt.s32.totalorder %v914_v15, 2  ;;  %v542_v26 = vadd.f32 %v528_v4, %v512_v8 }
 0x1f5   :  { %v515_v48 = vpop.permute.xlu0 %514  ;;  %vm1575_vm3 = vmmov %vm1574_vm12  ;;  %v543_v27 = vadd.f32 %v529_v50, %v513_v9  ;;  %vm1578_vm2 = vcmp.ge.s32.totalorder %v920_v21, 2  ;;  %vm1579_vm5 = vcmp.ge.s32.totalorder %v923_v22, 2  ;;  %v549_v21 = vmul.f32 0.4, %v1244_v20 }
 0x1f6   :  { %v270_v6 = vmul.f32 0.05, %v268_v63  ;;  %v271_v7 = vmul.f32 0.05, %v269_v61  ;;  %v518_v23 = vsel %vm1574_vm12, %v515_v48, %v517_v0  ;;  %v519_v24 = vsel %vm1575_vm3, %v517_v0, %v515_v48 }
 0x1f7   :  { %v520_v31 = vsel %vm1578_vm2, %v519_v24, %v512_v8  ;;  %v521_v32 = vsel %vm1579_vm5, %v518_v23, %v513_v9  ;;  %v544_v39 = vmul.f32 0.25, %v542_v26  ;;  %v545_v36 = vmul.f32 0.25, %v543_v27 }
 0x1f8   :  { %v276_v19 = vadd.f32 %v274_v1, %v270_v6  ;;  %v277_v17 = vadd.f32 %v275_v2, %v271_v7  ;;  %v533_v25 = vpop.permute.xlu1 %532  ;;  %vm1582_vm12 = vcmp.lt.s32.totalorder %v914_v15, 112  ;;  %vm1586_vm2 = vcmp.le.s32.totalorder %v1054_v42, 14 }
 0x1f9   :  { %v531_v28 = vpop.permute.xlu0 %530  ;;  %vm1583_vm3 = vmmov %vm1582_vm12  ;;  %vm1587_vm5 = vcmp.le.s32.totalorder %v1057_v43, 14 }
 0x1fa   :  { %v1334_v29 = vadd.f32 %v278_v14, %v276_v19  ;;  %v1336_v30 = vadd.f32 %v279_v13, %v277_v17  ;;  %v534_v59 = vsel %vm1576_vm0, %v531_v28, %v533_v25  ;;  %v535_v60 = vsel %vm1577_vm1, %v533_v25, %v531_v28 }
 0x1fb   :  { %v536_v33 = vsel %vm1580_vm9, %v534_v59, %v528_v4  ;;  %v537_v34 = vsel %vm1581_vm13, %v535_v60, %v529_v50  ;;  %vm1584_vm0 = vcmp.lt.s32.totalorder %v914_v15, 16  ;;  %vm1588_vm9 = vmmov %vm1583_vm3 }
 0x1fc   :  { %v538_v35 = vadd.f32 %v536_v33, %v520_v31  ;;  %v539_v38 = vadd.f32 %v537_v34, %v521_v32  ;;  %284 = vrot.lane.b32.xlu1 %v1336_v30, %s811_s23  ;;  %282 = vrot.lane.b32.xlu0 %v1334_v29, %s811_s23  ;;  %vm1585_vm1 = vmmov %vm1584_vm0 }
 0x1fd   :  { %vm1589_vm13 = vmmov %vm1583_vm3 }
 0x1fe   :  { %v540_v40 = vmul.f32 0.05, %v538_v35  ;;  %v541_v41 = vmul.f32 0.05, %v539_v38 }
 0x200   :  { %v546_v37 = vadd.f32 %v544_v39, %v540_v40  ;;  %v547_v45 = vadd.f32 %v545_v36, %v541_v41  ;;  %300 = vrot.lane.b32.xlu1 %v1336_v30, %s818_s17  ;;  %298 = vrot.lane.b32.xlu0 %v1334_v29, %s818_s17 }
 0x202   :  { %v1360_v22 = vadd.f32 %v548_v44, %v546_v37  ;;  %v1362_v46 = vadd.f32 %v549_v21, %v547_v45  ;;  %v325_v21 = vmul.f32 0.4, %v1336_v30  ;;  %v324_v37 = vmul.f32 0.4, %v1334_v29 }
 0x204   :  { %554 = vrot.lane.b32.xlu1 %v1362_v46, %s811_s23  ;;  %552 = vrot.lane.b32.xlu0 %v1360_v22, %s811_s23  ;;  %s379_s23 = smul.f32 10.0, %s1483_s22 }
 0x208   :  { %570 = vrot.lane.b32.xlu1 %v1362_v46, %s818_s17  ;;  %568 = vrot.lane.b32.xlu0 %v1360_v22, %s818_s17 }
 0x20c   :  { %292 = vrot.lane.b32.xlu1 %v1336_v30, %s819_s18  ;;  %290 = vrot.lane.b32.xlu0 %v1334_v29, %s819_s18 }
 0x210   :  { %308 = vrot.lane.b32.xlu1 %v1336_v30, %s820_s19  ;;  %306 = vrot.lane.b32.xlu0 %v1334_v29, %s820_s19 }
 0x214   :  { %562 = vrot.lane.b32.xlu1 %v1362_v46, %s819_s18  ;;  %560 = vrot.lane.b32.xlu0 %v1360_v22, %s819_s18 }
 0x218   :  { %578 = vrot.lane.b32.xlu1 %v1362_v46, %s820_s19  ;;  %576 = vrot.lane.b32.xlu0 %v1360_v22, %s820_s19 }
 0x26e   :  { %v285_v20 = vpop.permute.xlu1 %284  ;;  %v283_v16 = vpop.permute.xlu0 %282 }
 0x26f   :  { %v286_v57 = vsel %vm1584_vm0, %v283_v16, %v285_v20  ;;  %v287_v62 = vsel %vm1585_vm1, %v285_v20, %v283_v16  ;;  %vm1592_vm1 = vmmov %vm1584_vm0 }
 0x272   :  { %v301_v47 = vpop.permute.xlu1 %300  ;;  %v299_v18 = vpop.permute.xlu0 %298 }
 0x273   :  { %v302_v53 = vsel %vm1582_vm12, %v299_v18, %v301_v47  ;;  %v303_v54 = vsel %vm1583_vm3, %v301_v47, %v299_v18  ;;  %vm1590_vm12 = vcmp.ge.s32.totalorder %v1054_v42, 1  ;;  %vm1591_vm3 = vcmp.ge.s32.totalorder %v1057_v43, 1 }
 0x274   :  { %v304_v61 = vsel %vm1586_vm2, %v302_v53, %v1334_v29  ;;  %v305_v0 = vsel %vm1587_vm5, %v303_v54, %v1336_v30  ;;  %v288_v48 = vsel %vm1590_vm12, %v287_v62, %v1334_v29  ;;  %v289_v4 = vsel %vm1591_vm3, %v286_v57, %v1336_v30 }
 0x275   :  { %v318_v7 = vadd.f32 %v304_v61, %v288_v48  ;;  %v319_v8 = vadd.f32 %v305_v0, %v289_v4 }
 0x276   :  { %v555_v49 = vpop.permute.xlu1 %554  ;;  %v553_v52 = vpop.permute.xlu0 %552 }
 0x277   :  { %v556_v9 = vsel %vm1584_vm0, %v553_v52, %v555_v49  ;;  %v557_v13 = vsel %vm1592_vm1, %v555_v49, %v553_v52  ;;  %v320_v36 = vmul.f32 0.25, %v318_v7  ;;  %v321_v40 = vmul.f32 0.25, %v319_v8 }
 0x278   :  { %v558_v60 = vsel %vm1590_vm12, %v557_v13, %v1360_v22  ;;  %v559_v31 = vsel %vm1591_vm3, %v556_v9, %v1362_v46 }
 0x27a   :  { %v571_v55 = vpop.permute.xlu1 %570  ;;  %v569_v56 = vpop.permute.xlu0 %568 }
 0x27b   :  { %v572_v1 = vsel %vm1588_vm9, %v569_v56, %v571_v55  ;;  %v573_v2 = vsel %vm1589_vm13, %v571_v55, %v569_v56  ;;  %vm1593_vm9 = vcmp.ge.s32.totalorder %v1057_v43, 2  ;;  %vm1594_vm13 = vcmp.le.s32.totalorder %v1057_v43, 13 }
 0x27c   :  { %v574_v17 = vsel %vm1586_vm2, %v572_v1, %v1360_v22  ;;  %v575_v23 = vsel %vm1587_vm5, %v573_v2, %v1362_v46  ;;  %vm1595_vm0 = vmmov %vm1593_vm9  ;;  %vm679_vm2 = vcmp.lt.s32.totalorder %v56_v12, 256 }
 0x27d   :  { %v588_v34 = vadd.f32 %v574_v17, %v558_v60  ;;  %v589_v35 = vadd.f32 %v575_v23, %v559_v31 }
 0x27e   :  { %v293_v58 = vpop.permute.xlu1 %292  ;;  %v291_v63 = vpop.permute.xlu0 %290 }
 0x27f   :  { %v294_v50 = vsel %vm173_vm8, %v291_v63, %v293_v58  ;;  %v295_v6 = vsel %vm173_vm8, %v293_v58, %v291_v63  ;;  %v590_v18 = vmul.f32 0.25, %v588_v34  ;;  %v591_v49 = vmul.f32 0.25, %v589_v35 }
 0x280   :  { %v296_v26 = vsel %vm75_vm7, %v295_v6, %v288_v48  ;;  %v297_v27 = vsel %vm1593_vm9, %v294_v50, %v289_v4 }
 0x282   :  { %v309_v14 = vpop.permute.xlu1 %308  ;;  %v307_v19 = vpop.permute.xlu0 %306 }
 0x283   :  { %v310_v24 = vsel %vm191_vm4, %v307_v19, %v309_v14  ;;  %v311_v25 = vsel %vm191_vm4, %v309_v14, %v307_v19 }
 0x284   :  { %v312_v28 = vsel %vm79_vm6, %v310_v24, %v304_v61  ;;  %v313_v59 = vsel %vm1594_vm13, %v311_v25, %v305_v0 }
 0x285   :  { %v314_v32 = vadd.f32 %v312_v28, %v296_v26  ;;  %v315_v33 = vadd.f32 %v313_v59, %v297_v27  ;;  %v594_v28 = vmul.f32 0.4, %v1360_v22  ;;  %v595_v59 = vmul.f32 0.4, %v1362_v46 }
 0x286   :  { %v563_v38 = vpop.permute.xlu1 %562  ;;  %v561_v39 = vpop.permute.xlu0 %560 }
 0x287   :  { %v316_v41 = vmul.f32 0.05, %v314_v32  ;;  %v317_v44 = vmul.f32 0.05, %v315_v33  ;;  %v564_v16 = vsel %vm173_vm8, %v561_v39, %v563_v38  ;;  %v565_v47 = vsel %vm173_vm8, %v563_v38, %v561_v39  ;;  %vm1596_vm8 = vmmov %vm1594_vm13 }
 0x288   :  { %v566_v30 = vsel %vm75_vm7, %v565_v47, %v558_v60  ;;  %v567_v57 = vsel %vm1595_vm0, %v564_v16, %v559_v31 }
 0x289   :  { %v322_v45 = vadd.f32 %v320_v36, %v316_v41  ;;  %v323_v20 = vadd.f32 %v321_v40, %v317_v44  ;;  %v354_v36 = vstv %s103_s21 }
 0x28a   :  { %v579_v52 = vpop.permute.xlu1 %578  ;;  %v577_v55 = vpop.permute.xlu0 %576 }
 0x28b   :  { %v326_v56 = vadd.f32 %v324_v37, %v322_v45  ;;  %v327_v53 = vadd.f32 %v325_v21, %v323_v20  ;;  %v580_v54 = vsel %vm191_vm4, %v577_v55, %v579_v52  ;;  %v581_v29 = vsel %vm191_vm4, %v579_v52, %v577_v55 }
 0x28c   :  { %v582_v62 = vsel %vm79_vm6, %v580_v54, %v574_v17  ;;  %v583_v58 = vsel %vm1596_vm8, %v581_v29, %v575_v23 }
 0x28d   :  { %v328_v63 = vrot.slane %v326_v56, 7  ;;  %v329_v61 = vrot.slane %v327_v53, 7  ;;  %v332_v0 = vrot.slane %v326_v56, 6  ;;  %v333_v1 = vrot.slane %v327_v53, 6 }
 0x28e   :  { %v336_v15 = vrot.slane %v326_v56, 1  ;;  %v337_v2 = vrot.slane %v327_v53, 1  ;;  %v340_v48 = vrot.slane %v326_v56, 2  ;;  %v341_v4 = vrot.slane %v327_v53, 2 }
 0x28f   :  { %v330_v50 = vsel %vm81_vm10, %v328_v63, %v326_v56  ;;  %v331_v6 = vsel %vm81_vm10, %v329_v61, %v327_v53  ;;  %v584_v7 = vadd.f32 %v582_v62, %v566_v30  ;;  %v585_v42 = vadd.f32 %v583_v58, %v567_v57 }
 0x290   :  { %v334_v43 = vsel %vm82_vm11, %v332_v0, %v330_v50  ;;  %v335_v8 = vsel %vm82_vm11, %v333_v1, %v331_v6  ;;  %v338_v9 = vsel %vm83_vm15, %v336_v15, %v326_v56  ;;  %v339_v13 = vsel %vm83_vm15, %v337_v2, %v327_v53 }
 0x291   :  { %v342_v14 = vsel %vm84_vm14, %v340_v48, %v338_v9  ;;  %v343_v19 = vsel %vm84_vm14, %v341_v4, %v339_v13  ;;  %v346_v17 = vadd.f32 %v338_v9, %v330_v50  ;;  %v347_v23 = vadd.f32 %v339_v13, %v331_v6 }
 0x292   :  { %v344_v24 = vadd.f32 %v342_v14, %v334_v43  ;;  %v345_v25 = vadd.f32 %v343_v19, %v335_v8  ;;  %v586_v26 = vmul.f32 0.05, %v584_v7  ;;  %v587_v27 = vmul.f32 0.05, %v585_v42 }
 0x293   :  { %v624_v4 = vstv %s379_s23 }
 0x294   :  { %v348_v60 = vadd.f32 %v346_v17, %v344_v24  ;;  %v349_v31 = vadd.f32 %v347_v23, %v345_v25  ;;  %v592_v32 = vadd.f32 %v590_v18, %v586_v26  ;;  %v593_v33 = vadd.f32 %v591_v49, %v587_v27 }
 0x296   :  { %v350_v34 = vadd.f32 %v348_v60, %v326_v56  ;;  %v351_v35 = vadd.f32 %v349_v31, %v327_v53  ;;  %v596_v38 = vadd.f32 %v594_v28, %v592_v32  ;;  %v597_v39 = vadd.f32 %v595_v59, %v593_v33 }
 0x298   :  { %v352_v40 = vsub.f32 %v873_v3, %v350_v34  ;;  %v353_v41 = vsub.f32 %v879_v5, %v351_v35  ;;  %v598_v44 = vrot.slane %v596_v38, 7  ;;  %v599_v22 = vrot.slane %v597_v39, 7 }
 0x299   :  { %v602_v21 = vrot.slane %v596_v38, 6  ;;  %v603_v46 = vrot.slane %v597_v39, 6  ;;  %v606_v37 = vrot.slane %v596_v38, 1  ;;  %v607_v45 = vrot.slane %v597_v39, 1 }
 0x29a   :  { %v600_v20 = vsel %vm81_vm10, %v598_v44, %v596_v38  ;;  %v601_v16 = vsel %vm81_vm10, %v599_v22, %v597_v39  ;;  %v610_v47 = vrot.slane %v596_v38, 2  ;;  %v611_v18 = vrot.slane %v597_v39, 2 }
 0x29b   :  { %v604_v3 = vsel %vm82_vm11, %v602_v21, %v600_v20  ;;  %v605_v5 = vsel %vm82_vm11, %v603_v46, %v601_v16  ;;  %v608_v49 = vsel %vm83_vm15, %v606_v37, %v596_v38  ;;  %v609_v52 = vsel %vm83_vm15, %v607_v45, %v597_v39 }
 0x29c   :  { %v612_v55 = vsel %vm84_vm14, %v610_v47, %v608_v49  ;;  %v613_v56 = vsel %vm84_vm14, %v611_v18, %v609_v52  ;;  %v616_v53 = vadd.f32 %v608_v49, %v600_v20  ;;  %v617_v54 = vadd.f32 %v609_v52, %v601_v16 }
 0x29d   :  { %v614_v29 = vadd.f32 %v612_v55, %v604_v3  ;;  %v615_v30 = vadd.f32 %v613_v56, %v605_v5  ;;  %v355_v57 = vmul.f32 %v354_v36, %v352_v40  ;;  %v356_v62 = vmul.f32 %v354_v36, %v353_v41 }
 0x29e   :  { %v822_v46 = vmov 1966171168  }
 0x29f   :  { %v618_v58 = vadd.f32 %v616_v53, %v614_v29  ;;  %v619_v63 = vadd.f32 %v617_v54, %v615_v30  ;;  %v357_v61 = vmul.f32 %v355_v57, %v355_v57  ;;  %v358_v0 = vmul.f32 %v356_v62, %v356_v62 }
 0x2a0   :  { %v663_v37 = vunpack.c.l.s4 %v822_v46 }
 0x2a1   :  { %v620_v1 = vadd.f32 %v618_v58, %v596_v38  ;;  %v621_v15 = vadd.f32 %v619_v63, %v597_v39  ;;  %v359_v2 = vadd.f32 1e-06, %v357_v61  ;;  %v360_v48 = vadd.f32 1e-06, %v358_v0 }
 0x2a2   :  { %v664_v18 = vunpack.c.0.s8 %v663_v37 }
 0x2a3   :  { %v622_v50 = vsub.f32 %v887_v11, %v620_v1  ;;  %v623_v6 = vsub.f32 %v885_v10, %v621_v15  ;;  %715 = vrsqrt.f32 %v359_v2  ;;  %vm363_vm4 = vcmp.eq.f32.partialorder %v359_v2, inf }
 0x2a4   :  { %717 = vrsqrt.f32 %v360_v48  ;;  %vm365_vm6 = vcmp.eq.f32.partialorder %v359_v2, 0.0  ;;  %v366_v11 = vand.u32 2147483648, %v359_v2  ;;  %vm370_vm7 = vcmp.eq.f32.partialorder %v360_v48, inf }
 0x2a5   :  { %v625_v7 = vmul.f32 %v624_v4, %v622_v50  ;;  %v626_v42 = vmul.f32 %v624_v4, %v623_v6  ;;  %vm372_vm10 = vcmp.eq.f32.partialorder %v360_v48, 0.0  ;;  %v373_v26 = vand.u32 2147483648, %v360_v48 }
 0x2a6   :  { %v667_v55 = vsub.s32 %v664_v18, %v1080_v51 }
 0x2a7   :  { %v627_v43 = vmul.f32 %v625_v7, %v625_v7  ;;  %v628_v8 = vmul.f32 %v626_v42, %v626_v42 }
 0x2a9   :  { %v629_v9 = vadd.f32 1e-06, %v627_v43  ;;  %v630_v13 = vadd.f32 1e-06, %v628_v8 }
 0x2ab   :  { %719 = vrsqrt.f32 %v629_v9  ;;  %vm633_vm11 = vcmp.eq.f32.partialorder %v629_v9, inf  ;;  %v636_v59 = vand.u32 2147483648, %v629_v9  ;;  %vm635_vm14 = vcmp.eq.f32.partialorder %v629_v9, 0.0 }
 0x2ac   :  { %721 = vrsqrt.f32 %v630_v13  ;;  %vm640_vm15 = vcmp.eq.f32.partialorder %v630_v13, inf  ;;  %v643_v32 = vand.u32 2147483648, %v630_v13  ;;  %vm642_vm1 = vcmp.eq.f32.partialorder %v630_v13, 0.0 }
 0x2ad   :  { %v716_v14 = vpop.eup %715 }
 0x2ae   :  { %v718_v19 = vpop.eup %717  ;;  %v362_v17 = vmul.f32 %v716_v14, %v359_v2 }
 0x2af   :  { %v369_v23 = vmul.f32 %v718_v19, %v360_v48 }
 0x2b0   :  { %v364_v25 = vsel %vm363_vm4, %v359_v2, %v362_v17 }
 0x2b1   :  { %v371_v28 = vsel %vm370_vm7, %v360_v48, %v369_v23  ;;  %v367_v33 = vsel %vm365_vm6, %v366_v11, %v364_v25 }
 0x2b2   :  { %v374_v38 = vsel %vm372_vm10, %v373_v26, %v371_v28 }
 0x2b5   :  { %v720_v24 = vpop.eup %719 }
 0x2b6   :  { %v722_v10 = vpop.eup %721  ;;  %v632_v27 = vmul.f32 %v720_v24, %v629_v9 }
 0x2b7   :  { %v639_v60 = vmul.f32 %v722_v10, %v630_v13 }
 0x2b8   :  { %v634_v31 = vsel %vm633_vm11, %v629_v9, %v632_v27 }
 0x2b9   :  { %v637_v34 = vsel %vm635_vm14, %v636_v59, %v634_v31  ;;  %v641_v35 = vsel %vm640_vm15, %v630_v13, %v639_v60 }
 0x2ba   :  { %v644_v39 = vsel %vm642_vm1, %v643_v32, %v641_v35  ;;  %v645_v36 = vadd.f32 %v637_v34, %v367_v33 }
 0x2bb   :  { %v646_v40 = vadd.f32 %v644_v39, %v374_v38 }
 0x2bc   :  { %v647_v41 = vrot.slane %v645_v36, 4 }
 0x2bd   :  { %v653_v44 = vrot.slane %v646_v40, 4 }
 0x2be   :  { %v648_v22 = vadd.f32 %v647_v41, %v645_v36 }
 0x2bf   :  { %v654_v21 = vadd.f32 %v653_v44, %v646_v40 }
 0x2c0   :  { %v649_v45 = vrot.slane %v648_v22, 2 }
 0x2c1   :  { %v655_v20 = vrot.slane %v654_v21, 2 }
 0x2c2   :  { %v650_v16 = vadd.f32 %v649_v45, %v648_v22 }
 0x2c3   :  { %v656_v47 = vadd.f32 %v655_v20, %v654_v21 }
 0x2c4   :  { %v651_v3 = vrot.slane %v650_v16, 1 }
 0x2c5   :  { %v657_v5 = vrot.slane %v656_v47, 1 }
 0x2c6   :  { %v652_v49 = vadd.f32 %v651_v3, %v650_v16 }
 0x2c7   :  { %v658_v52 = vadd.f32 %v657_v5, %v656_v47 }
 0x2c9   :  { %v661_v56 = vcombine.low %v652_v49, %v658_v52 }
 0x2cb   :  { %v668_v53 = vrot.slane %v661_v56, %v667_v55 }
 0x2cd   :  { %v675_v54 = vrot.slane %v668_v53, %v667_v55 }
 0x2cf   :  { %681 = vst.msk [vmem:[#allocation9] sm:$0x3] %vm679_vm2, %v675_v54 }
 0x2d0   :  { %790 = shalt.err (!%p787_p11)
}
 0x2d1   :  { %s791_s29 = scalar_lea.hbm %s1524_s3, 32 }
 0x2d2   :  { %p792_p12 = scmp.ne.s32.totalorder %s1524_s3, %s791_s29  ;;  %p795_p13 = scmp.lt.u32.totalorder %s791_s29, %s1524_s3 }
 0x2d4   :  { %p797_p0 = pnand %p795_p13, %p792_p12 }
 0x2d6   :  { %800 = shalt.err (!%p797_p0)
}
 0x2d7   :  { %691 = dma.vmem_to_hbm [thread:$0]  %s689_s25, 32, %s1524_s3, [#allocation4]  }
 0x2d8   :  { %807 = dma.done.wait [#allocation4], 32  }
 0x2d9   :  { %808 = vsyncadd [#allocation4], 4294967264 }
 0x2da   :  { %695 = vsyncpa [#allocation3], 1 }
 0x2db   :  { %696 = vsyncpa [#allocation7], 1 }
 0x2dc   :  { %697 = vsyncpa [#allocation4], 1 }
 0x2dd   :  { %698 = vsyncpa [#allocation5], 1 }

</bundles_post_ra>
